<compile_context>
chip_gen: v7x
topology: tpu7x:2x2x1
jax: 0.10.0
libtpu: 0.0.40
codegen_flags: <defaults>
</compile_context>

<pallas_src>
import math

import jax
import jax.numpy as jnp
from jax import lax
from jax.experimental import pallas as pl
from jax.experimental.pallas import tpu as pltpu


# ----------------------------- Fused kernel -------------------------------- #

def make_fused_model_kernel(num_layers, Tc, n_chunks, B, H, n_slots):
    """Kernel: `num_layers` LSTM layers + output Linear for one batch block."""
    has_seq = num_layers > 1
    unroll = Tc if Tc <= 8 else 4        # partial unroll for long chunks (vregs)

    def kernel(*refs):
        idx = 0
        x_ref = refs[idx]; idx += 1                          # (1, T*B, Din) bf16
        layer_refs = []
        for _ in range(num_layers):                          # (wih, whh, bias)
            layer_refs.append((refs[idx], refs[idx + 1], refs[idx + 2]))
            idx += 3
        w_out_ref = refs[idx]; b_out_ref = refs[idx + 1]; idx += 2
        out_ref = refs[idx]; idx += 1                        # (B, out_dim) f32
        gbuf = refs[idx]; idx += 1                           # (n_slots, Tc*B, 4H) f32
        seq_ref = refs[idx] if has_seq else None             # (T*B, H) f32

        def load_chunk_x(ci):
            # static-offset chunk load, already 2-D: no in-kernel reshape
            return x_ref[0, pl.ds(ci * Tc * B, Tc * B), :]           # bf16

        def load_chunk_seq(ci):
            rows = seq_ref[pl.ds(ci * Tc * B, Tc * B), :]            # f32
            return rows.astype(jnp.bfloat16)                 # bf16 only for MXU

        def run_layer(load_chunk, wih_ref, whh_ref, b_ref, write_seq):
            wih = wih_ref[...]                               # (K, 4H)  bf16
            whh = whh_ref[...]                               # (H, 4H)  bf16 (hoisted)
            bias = b_ref[...]                                # (1, 4H)  f32
            # TODO(synk): keep W_hh resident in the MXU across the time loop via
            # pltpu.matmul_push_rhs/matmul_acc_lhs/matmul_pop once the bundle
            # dump confirms jnp.dot re-pushes the RHS every step.

            def project(ci, slot):
                xs = load_chunk(ci)                          # (Tc*B, K) bf16
                gbuf[slot, :, :] = (
                    jnp.dot(xs, wih, preferred_element_type=jnp.float32) + bias)

            project(0, 0)
            h = jnp.zeros((B, H), jnp.float32)
            c = jnp.zeros((B, H), jnp.float32)

            for ci in range(n_chunks):                       # static chunk loop
                slot = ci % n_slots
                if ci + 1 < n_chunks:
                    # Software pipeline: issue chunk ci+1's MXU projection into the
                    # other slot ahead of chunk ci's EUP/VPU-bound recurrence.
                    # Safe with the in-place seq buffer: only chunks <= ci have been
                    # overwritten, chunk ci+1 rows are still the layer's input.
                    project(ci + 1, (ci + 1) % n_slots)
                base = ci * Tc * B

                def step(t, carry, slot=slot, base=base):
                    h_prev, c_prev = carry                   # vreg-resident carry
                    row = pl.multiple_of(t * B, B)
                    gates = gbuf[slot, pl.ds(row, B), :] + jnp.dot(
                        h_prev.astype(jnp.bfloat16), whh,
                        preferred_element_type=jnp.float32)  # (B, 4H) f32
                    # For production H % 128 == 0 these slices are lane-tile
                    # aligned (free); at the H=32 demo size they cost a few XLU
                    # shuffles per step.
                    i_g = jax.nn.sigmoid(gates[:, 0 * H:1 * H])
                    f_g = jax.nn.sigmoid(gates[:, 1 * H:2 * H])
                    g_g = jnp.tanh(gates[:, 2 * H:3 * H])
                    o_g = jax.nn.sigmoid(gates[:, 3 * H:4 * H])
                    c_new = f_g * c_prev + i_g * g_g
                    h_new = o_g * jnp.tanh(c_new)
                    if write_seq:                            # non-last layers only
                        drow = pl.multiple_of(base + t * B, B)
                        seq_ref[pl.ds(drow, B), :] = h_new
                    return (h_new, c_new)

                h, c = lax.fori_loop(0, Tc, step, (h, c), unroll=unroll)
            return h

        h_last = None
        for layer in range(num_layers):
            wih_ref, whh_ref, b_ref = layer_refs[layer]
            load_chunk = load_chunk_x if layer == 0 else load_chunk_seq
            write_seq = layer < num_layers - 1
            h_last = run_layer(load_chunk, wih_ref, whh_ref, b_ref, write_seq)

        # Fused final Linear on h_{T-1}; only (B, out_dim) ever hits HBM.
        out_ref[...] = (
            jnp.dot(h_last, w_out_ref[...], preferred_element_type=jnp.float32)
            + b_out_ref[...])

    return kernel


# ------------------------------- Heuristics --------------------------------- #

def _vmem_limit_bytes():
    """Generation-aware VMEM budget: ~3/4 of physical (96 MiB v5e/v6e, 48 MiB v7x)."""
    cap = None
    try:
        cap = getattr(pltpu.get_tpu_info(), "vmem_capacity_bytes", None)
    except Exception:
        cap = None
    if not cap:
        cap = 64 * 1024 * 1024          # conservative (v7x-sized) fallback
    return int(cap * 3 // 4)


def _pick_time_chunk(T, B_blk, H, vmem_limit):
    """Largest divisor of T whose double-buffered gate scratch fits the budget."""
    budget = max(vmem_limit // 4, 1)    # headroom for x / seq / weights / DMA bufs
    per_step = 2 * B_blk * 4 * H * 4    # 2 slots, f32
    tc_max = max(1, budget // per_step)
    tc = 1
    for d in range(1, T + 1):
        if T % d == 0 and d <= tc_max:
            tc = d
    return tc


# ------------------------------- Wrapper ------------------------------------ #

def lstm_model_pallas(x, params):
    """x: (B, T, Din) float32 -> (B, output_dim) float32. One fused pallas_call."""
    B, T, Din = x.shape
    H = params["lstm"][0]["w_hh_t"].shape[0]
    out_dim = params["out_layer"]["w_t"].shape[1]
    num_layers = len(params["lstm"])

    # --- batch padding / blocking: grid axis feeds both TCs on v7x ----------
    B_pad8 = max(8, ((B + 7) // 8) * 8)
    if B_pad8 <= 8:
        B_blk = B_pad8                             # one sublane tile
    else:
        B_blk = 32 if B_pad8 >= 32 else 16         # multiple of 16 (bf16 tiling)
    B_pad = -(-B_pad8 // B_blk) * B_blk
    n_bblk = B_pad // B_blk

    vmem_limit = _vmem_limit_bytes()
    Tc = _pick_time_chunk(T, B_blk, H, vmem_limit)
    n_chunks = T // Tc
    n_slots = 2 if n_chunks > 1 else 1

    # --- relayout: (B,T,D) -> (n_blk, T*B_blk, D) time-major, bf16 ----------
    # TODO(synk): verify in HLO that transpose+pad+cast fuse to one copy;
    # otherwise do the relayout once in VMEM with pltpu.einshape.
    x_tm = jnp.transpose(x, (1, 0, 2))             # (T, B, Din)
    if B_pad != B:
        x_tm = jnp.pad(x_tm, ((0, 0), (0, B_pad - B), (0, 0)))
    x_blk = (x_tm.reshape(T, n_bblk, B_blk, Din)
                  .transpose(1, 0, 2, 3)
                  .reshape(n_bblk, T * B_blk, Din)
                  .astype(jnp.bfloat16))

    inputs = [x_blk]
    in_specs = [pl.BlockSpec((1, T * B_blk, Din), lambda b: (b, 0, 0))]
    for lp in params["lstm"]:
        wih = lp["w_ih_t"].astype(jnp.bfloat16)    # (K, 4H)
        whh = lp["w_hh_t"].astype(jnp.bfloat16)    # (H, 4H)
        bias = lp["bias"]                          # (1, 4H) f32
        inputs += [wih, whh, bias]
        in_specs += [
            pl.BlockSpec(wih.shape, lambda b_: (0, 0)),
            pl.BlockSpec(whh.shape, lambda b_: (0, 0)),
            pl.BlockSpec(bias.shape, lambda b_: (0, 0)),
        ]
    w_out, b_out = params["out_layer"]["w_t"], params["out_layer"]["bias"]
    inputs += [w_out, b_out]
    in_specs += [pl.BlockSpec(w_out.shape, lambda b_: (0, 0)),
                 pl.BlockSpec(b_out.shape, lambda b_: (0, 0))]

    scratch_shapes = [pltpu.VMEM((n_slots, Tc * B_blk, 4 * H), jnp.float32)]
    if num_layers > 1:
        # Single inter-layer sequence buffer, rewritten in place by each layer.
        # Kept f32 (dynamic sublane-offset stores of packed bf16 are fragile);
        # it is cast to bf16 only when fed to the next layer's MXU projection.
        scratch_shapes += [pltpu.VMEM((T * B_blk, H), jnp.float32)]

    kernel = make_fused_model_kernel(num_layers, Tc, n_chunks, B_blk, H, n_slots)

    out = pl.pallas_call(
        kernel,
        out_shape=jax.ShapeDtypeStruct((B_pad, out_dim), jnp.float32),
        grid=(n_bblk,),
        in_specs=in_specs,
        out_specs=pl.BlockSpec((B_blk, out_dim), lambda b: (b, 0)),
        scratch_shapes=scratch_shapes,
        compiler_params=pltpu.CompilerParams(
            dimension_semantics=("parallel",),
            vmem_limit_bytes=vmem_limit,
        ),
    )(*inputs)
    return out[:B]


def lstm_model_forward(x, params, noise_key):
    """Full forward: Gaussian input noise (as in the PyTorch forward) + fused kernel."""
    # TODO(synk): fold the Gaussian input noise into the fused kernel via
    # pltpu.prng_seed / pltpu.prng_random_bits (Box-Muller) to skip one HBM pass.
    noise = jnp.sqrt(jnp.float32(0.1)) * jax.random.normal(
        noise_key, x.shape, dtype=x.dtype)
    return lstm_model_pallas(x + noise, params)


# ----------------------------- Params / reference --------------------------- #

def init_params(key, input_dim, hidden_dim, layer_dim, output_dim):
    """PyTorch-style uniform(-1/sqrt(H), 1/sqrt(H)) init (f32 masters)."""
    params = {"lstm": []}
    k = 1.0 / math.sqrt(hidden_dim)
    for layer in range(layer_dim):
        in_dim = input_dim if layer == 0 else hidden_dim
        key, k1, k2, k3, k4 = jax.random.split(key, 5)
        w_ih = jax.random.uniform(k1, (4 * hidden_dim, in_dim), jnp.float32, -k, k)
        w_hh = jax.random.uniform(k2, (4 * hidden_dim, hidden_dim), jnp.float32, -k, k)
        b_ih = jax.random.uniform(k3, (4 * hidden_dim,), jnp.float32, -k, k)
        b_hh = jax.random.uniform(k4, (4 * hidden_dim,), jnp.float32, -k, k)
        params["lstm"].append({
            "w_ih_t": w_ih.T,                              # (in_dim, 4H)
            "w_hh_t": w_hh.T,                              # (H, 4H)
            "bias": (b_ih + b_hh)[None, :],                # (1, 4H)
        })
    key, k1, k2 = jax.random.split(key, 3)
    w_out = jax.random.uniform(k1, (output_dim, hidden_dim), jnp.float32, -k, k)
    b_out = jax.random.uniform(k2, (output_dim,), jnp.float32, -k, k)
    params["out_layer"] = {"w_t": w_out.T, "bias": b_out[None, :]}
    # n_fc_layers = 1 -> self.fc is empty (no hidden Linear layers)
    return params


def lstm_model_reference(x, params):
    """Pure-JAX reference mirroring the kernel's bf16 matmul inputs. x pre-noised."""
    seq = x                                                 # (B, T, K) f32
    h = None
    for lp in params["lstm"]:
        wih = lp["w_ih_t"].astype(jnp.bfloat16)
        whh = lp["w_hh_t"].astype(jnp.bfloat16)
        bias = lp["bias"]
        Bb, Tt, _ = seq.shape
        H = lp["w_hh_t"].shape[0]
        seq_b = seq.astype(jnp.bfloat16)
        h = jnp.zeros((Bb, H), jnp.float32)
        c = jnp.zeros((Bb, H), jnp.float32)
        outs = []
        for t in range(Tt):
            gates = (jnp.dot(seq_b[:, t, :], wih, preferred_element_type=jnp.float32)
                     + jnp.dot(h.astype(jnp.bfloat16), whh,
                               preferred_element_type=jnp.float32)
                     + bias)
            i = jax.nn.sigmoid(gates[:, 0 * H:1 * H])
            f = jax.nn.sigmoid(gates[:, 1 * H:2 * H])
            g = jnp.tanh(gates[:, 2 * H:3 * H])
            o = jax.nn.sigmoid(gates[:, 3 * H:4 * H])
            c = f * c + i * g
            h = o * jnp.tanh(c)
            outs.append(h)
        seq = jnp.stack(outs, axis=1)
    return (jnp.dot(h, params["out_layer"]["w_t"], preferred_element_type=jnp.float32)
            + params["out_layer"]["bias"])


# --------------------------------- Main -------------------------------------- #

if __name__ == "__main__":
    B, T = 2, 8
    input_dim, hidden_dim, layer_dim, output_dim = 16, 32, 2, 4

    root = jax.random.PRNGKey(0)
    k_param, k_data, k_noise = jax.random.split(root, 3)

    params = init_params(k_param, input_dim, hidden_dim, layer_dim, output_dim)
    x = jax.random.normal(k_data, (B, T, input_dim), dtype=jnp.float32)

    out = lstm_model_forward(x, params, k_noise)
    out = jax.block_until_ready(out)

    assert out.shape == (B, output_dim), out.shape
    assert bool(jnp.all(jnp.isfinite(out)))

    # Correctness against a pure-JAX reference with the same noise realization
    # and the same bf16 matmul-input rounding.
    noise = jnp.sqrt(jnp.float32(0.1)) * jax.random.normal(k_noise, x.shape, x.dtype)
    ref = lstm_model_reference(x + noise, params)
    assert jnp.allclose(out, ref, rtol=2e-2, atol=2e-2), \
        float(jnp.max(jnp.abs(out - ref)))

    print("KERNEL_OK")
</pallas_src>

<mosaic_0001>
module attributes {stable_mosaic.version = 11 : i64} {
  func.func @kernel(%arg0: i32, %arg1: memref<1x64x16xbf16, #tpu.memory_space<vmem>>, %arg2: memref<16x128xbf16, #tpu.memory_space<vmem>>, %arg3: memref<32x128xbf16, #tpu.memory_space<vmem>>, %arg4: memref<1x128xf32, #tpu.memory_space<vmem>>, %arg5: memref<32x128xbf16, #tpu.memory_space<vmem>>, %arg6: memref<32x128xbf16, #tpu.memory_space<vmem>>, %arg7: memref<1x128xf32, #tpu.memory_space<vmem>>, %arg8: memref<32x4xf32, #tpu.memory_space<vmem>>, %arg9: memref<1x4xf32, #tpu.memory_space<vmem>>, %arg10: memref<8x4xf32, #tpu.memory_space<vmem>>, %arg11: memref<1x64x128xf32, #tpu.memory_space<vmem>>, %arg12: memref<64x32xf32, #tpu.memory_space<vmem>>) attributes {dimension_semantics = [#tpu.dimension_semantics<parallel>], iteration_bounds = array<i64: 1>, scalar_prefetch = 0 : i64, scratch_operands = 2 : i64, tpu.core_type = #tpu.core_type<tc>, window_params = [{transform_indices = @transform_0, window_bounds = array<i64: 1, 64, 16>}, {pipeline_mode = #tpu.pipeline_mode<synchronous>, transform_indices = @transform_1, window_bounds = array<i64: 16, 128>}, {pipeline_mode = #tpu.pipeline_mode<synchronous>, transform_indices = @transform_2, window_bounds = array<i64: 32, 128>}, {pipeline_mode = #tpu.pipeline_mode<synchronous>, transform_indices = @transform_3, window_bounds = array<i64: 1, 128>}, {pipeline_mode = #tpu.pipeline_mode<synchronous>, transform_indices = @transform_4, window_bounds = array<i64: 32, 128>}, {pipeline_mode = #tpu.pipeline_mode<synchronous>, transform_indices = @transform_5, window_bounds = array<i64: 32, 128>}, {pipeline_mode = #tpu.pipeline_mode<synchronous>, transform_indices = @transform_6, window_bounds = array<i64: 1, 128>}, {pipeline_mode = #tpu.pipeline_mode<synchronous>, transform_indices = @transform_7, window_bounds = array<i64: 32, 4>}, {pipeline_mode = #tpu.pipeline_mode<synchronous>, transform_indices = @transform_8, window_bounds = array<i64: 1, 4>}, {transform_indices = @transform_9, window_bounds = array<i64: 8, 4>}]} {
    %c0 = arith.constant 0 : index
    %c0_0 = arith.constant 0 : index
    %0 = vector.load %arg2[%c0, %c0_0] : memref<16x128xbf16, #tpu.memory_space<vmem>>, vector<16x128xbf16>
    %c0_1 = arith.constant 0 : index
    %c0_2 = arith.constant 0 : index
    %1 = vector.load %arg3[%c0_1, %c0_2] : memref<32x128xbf16, #tpu.memory_space<vmem>>, vector<32x128xbf16>
    %c0_3 = arith.constant 0 : index
    %c0_4 = arith.constant 0 : index
    %2 = vector.load %arg4[%c0_3, %c0_4] : memref<1x128xf32, #tpu.memory_space<vmem>>, vector<1x128xf32>
    %c0_5 = arith.constant 0 : index
    %c0_6 = arith.constant 0 : index
    %c0_7 = arith.constant 0 : index
    %3 = vector.load %arg1[%c0_5, %c0_6, %c0_7] : memref<1x64x16xbf16, #tpu.memory_space<vmem>>, vector<1x64x16xbf16>
    %4 = vector.shape_cast %3 : vector<1x64x16xbf16> to vector<64x16xbf16>
    %cst = arith.constant dense<0.000000e+00> : vector<64x128xf32>
    %5 = tpu.matmul %4, %0, %cst {dimension_numbers = #tpu.dot_dimension_numbers<[1], [0], [0], [1], [0, 0, 1, 1], [], []>} : vector<64x16xbf16>, vector<16x128xbf16>, vector<64x128xf32> -> vector<64x128xf32>
    %6 = vector.broadcast %2 : vector<1x128xf32> to vector<64x128xf32>
    %7 = arith.addf %5, %6 : vector<64x128xf32>
    %c0_8 = arith.constant 0 : index
    %c0_9 = arith.constant 0 : index
    %c0_10 = arith.constant 0 : index
    %8 = vector.load %arg11[%c0_8, %c0_9, %c0_10] : memref<1x64x128xf32, #tpu.memory_space<vmem>>, vector<1x64x128xf32>
    %9 = vector.shape_cast %8 : vector<1x64x128xf32> to vector<64x128xf32>
    %10 = vector.shape_cast %7 : vector<64x128xf32> to vector<1x64x128xf32>
    tpu.vector_store %arg11[%c0_8, %c0_9, %c0_10], %10 {strides = array<i32>} : memref<1x64x128xf32, #tpu.memory_space<vmem>>, vector<1x64x128xf32>,
    %cst_11 = arith.constant 0.000000e+00 : f32
    %11 = vector.broadcast %cst_11 : f32 to vector<8x32xf32>
    %cst_12 = arith.constant 0.000000e+00 : f32
    %12 = vector.broadcast %cst_12 : f32 to vector<8x32xf32>
    %c0_i32 = arith.constant 0 : i32
    %c8_i32 = arith.constant 8 : i32
    %13 = arith.muli %c0_i32, %c8_i32 : i32
    %14 = tpu.assume_multiple %13, 8 : i32
    %c0_13 = arith.constant 0 : index
    %15 = arith.index_cast %14 : i32 to index
    %c0_14 = arith.constant 0 : index
    %16 = vector.load %arg11[%c0_13, %15, %c0_14] : memref<1x64x128xf32, #tpu.memory_space<vmem>>, vector<1x8x128xf32>
    %17 = vector.shape_cast %16 : vector<1x8x128xf32> to vector<8x128xf32>
    %18 = arith.truncf %11 : vector<8x32xf32> to vector<8x32xbf16>
    %cst_15 = arith.constant dense<0.000000e+00> : vector<8x128xf32>
    %19 = tpu.matmul %18, %1, %cst_15 {dimension_numbers = #tpu.dot_dimension_numbers<[1], [0], [0], [1], [0, 0, 1, 1], [], []>} : vector<8x32xbf16>, vector<32x128xbf16>, vector<8x128xf32> -> vector<8x128xf32>
    %20 = arith.addf %17, %19 : vector<8x128xf32>
    %21 = vector.extract_strided_slice %20 {offsets = [0, 0], sizes = [8, 32], strides = [1, 1]} : vector<8x128xf32> to vector<8x32xf32>
    %22 = arith.negf %21 : vector<8x32xf32>
    %23 = math.exp %22 : vector<8x32xf32>
    %cst_16 = arith.constant 1.000000e+00 : f32
    %24 = vector.broadcast %cst_16 : f32 to vector<8x32xf32>
    %25 = arith.addf %24, %23 : vector<8x32xf32>
    %26 = arith.divf %24, %25 : vector<8x32xf32>
    %27 = vector.extract_strided_slice %20 {offsets = [0, 32], sizes = [8, 32], strides = [1, 1]} : vector<8x128xf32> to vector<8x32xf32>
    %28 = arith.negf %27 : vector<8x32xf32>
    %29 = math.exp %28 : vector<8x32xf32>
    %cst_17 = arith.constant 1.000000e+00 : f32
    %30 = vector.broadcast %cst_17 : f32 to vector<8x32xf32>
    %31 = arith.addf %30, %29 : vector<8x32xf32>
    %32 = arith.divf %30, %31 : vector<8x32xf32>
    %33 = vector.extract_strided_slice %20 {offsets = [0, 64], sizes = [8, 32], strides = [1, 1]} : vector<8x128xf32> to vector<8x32xf32>
    %34 = math.tanh %33 : vector<8x32xf32>
    %35 = vector.extract_strided_slice %20 {offsets = [0, 96], sizes = [8, 32], strides = [1, 1]} : vector<8x128xf32> to vector<8x32xf32>
    %36 = arith.negf %35 : vector<8x32xf32>
    %37 = math.exp %36 : vector<8x32xf32>
    %cst_18 = arith.constant 1.000000e+00 : f32
    %38 = vector.broadcast %cst_18 : f32 to vector<8x32xf32>
    %39 = arith.addf %38, %37 : vector<8x32xf32>
    %40 = arith.divf %38, %39 : vector<8x32xf32>
    %41 = arith.mulf %32, %12 : vector<8x32xf32>
    %42 = arith.mulf %26, %34 : vector<8x32xf32>
    %43 = arith.addf %41, %42 : vector<8x32xf32>
    %44 = math.tanh %43 : vector<8x32xf32>
    %45 = arith.mulf %40, %44 : vector<8x32xf32>
    %c8_i32_19 = arith.constant 8 : i32
    %46 = arith.muli %c0_i32, %c8_i32_19 : i32
    %c0_i32_20 = arith.constant 0 : i32
    %47 = arith.addi %c0_i32_20, %46 : i32
    %48 = tpu.assume_multiple %47, 8 : i32
    %49 = arith.index_cast %48 : i32 to index
    %c0_21 = arith.constant 0 : index
    %50 = vector.load %arg12[%49, %c0_21] : memref<64x32xf32, #tpu.memory_space<vmem>>, vector<8x32xf32>
    tpu.vector_store %arg12[%49, %c0_21], %45 {strides = array<i32>} : memref<64x32xf32, #tpu.memory_space<vmem>>, vector<8x32xf32>,
    %c1_i32 = arith.constant 1 : i32
    %c8_i32_22 = arith.constant 8 : i32
    %51 = arith.muli %c1_i32, %c8_i32_22 : i32
    %52 = tpu.assume_multiple %51, 8 : i32
    %c0_23 = arith.constant 0 : index
    %53 = arith.index_cast %52 : i32 to index
    %c0_24 = arith.constant 0 : index
    %54 = vector.load %arg11[%c0_23, %53, %c0_24] : memref<1x64x128xf32, #tpu.memory_space<vmem>>, vector<1x8x128xf32>
    %55 = vector.shape_cast %54 : vector<1x8x128xf32> to vector<8x128xf32>
    %56 = arith.truncf %45 : vector<8x32xf32> to vector<8x32xbf16>
    %cst_25 = arith.constant dense<0.000000e+00> : vector<8x128xf32>
    %57 = tpu.matmul %56, %1, %cst_25 {dimension_numbers = #tpu.dot_dimension_numbers<[1], [0], [0], [1], [0, 0, 1, 1], [], []>} : vector<8x32xbf16>, vector<32x128xbf16>, vector<8x128xf32> -> vector<8x128xf32>
    %58 = arith.addf %55, %57 : vector<8x128xf32>
    %59 = vector.extract_strided_slice %58 {offsets = [0, 0], sizes = [8, 32], strides = [1, 1]} : vector<8x128xf32> to vector<8x32xf32>
    %60 = arith.negf %59 : vector<8x32xf32>
    %61 = math.exp %60 : vector<8x32xf32>
    %cst_26 = arith.constant 1.000000e+00 : f32
    %62 = vector.broadcast %cst_26 : f32 to vector<8x32xf32>
    %63 = arith.addf %62, %61 : vector<8x32xf32>
    %64 = arith.divf %62, %63 : vector<8x32xf32>
    %65 = vector.extract_strided_slice %58 {offsets = [0, 32], sizes = [8, 32], strides = [1, 1]} : vector<8x128xf32> to vector<8x32xf32>
    %66 = arith.negf %65 : vector<8x32xf32>
    %67 = math.exp %66 : vector<8x32xf32>
    %cst_27 = arith.constant 1.000000e+00 : f32
    %68 = vector.broadcast %cst_27 : f32 to vector<8x32xf32>
    %69 = arith.addf %68, %67 : vector<8x32xf32>
    %70 = arith.divf %68, %69 : vector<8x32xf32>
    %71 = vector.extract_strided_slice %58 {offsets = [0, 64], sizes = [8, 32], strides = [1, 1]} : vector<8x128xf32> to vector<8x32xf32>
    %72 = math.tanh %71 : vector<8x32xf32>
    %73 = vector.extract_strided_slice %58 {offsets = [0, 96], sizes = [8, 32], strides = [1, 1]} : vector<8x128xf32> to vector<8x32xf32>
    %74 = arith.negf %73 : vector<8x32xf32>
    %75 = math.exp %74 : vector<8x32xf32>
    %cst_28 = arith.constant 1.000000e+00 : f32
    %76 = vector.broadcast %cst_28 : f32 to vector<8x32xf32>
    %77 = arith.addf %76, %75 : vector<8x32xf32>
    %78 = arith.divf %76, %77 : vector<8x32xf32>
    %79 = arith.mulf %70, %43 : vector<8x32xf32>
    %80 = arith.mulf %64, %72 : vector<8x32xf32>
    %81 = arith.addf %79, %80 : vector<8x32xf32>
    %82 = math.tanh %81 : vector<8x32xf32>
    %83 = arith.mulf %78, %82 : vector<8x32xf32>
    %c8_i32_29 = arith.constant 8 : i32
    %84 = arith.muli %c1_i32, %c8_i32_29 : i32
    %c0_i32_30 = arith.constant 0 : i32
    %85 = arith.addi %c0_i32_30, %84 : i32
    %86 = tpu.assume_multiple %85, 8 : i32
    %87 = arith.index_cast %86 : i32 to index
    %c0_31 = arith.constant 0 : index
    %88 = vector.load %arg12[%87, %c0_31] : memref<64x32xf32, #tpu.memory_space<vmem>>, vector<8x32xf32>
    tpu.vector_store %arg12[%87, %c0_31], %83 {strides = array<i32>} : memref<64x32xf32, #tpu.memory_space<vmem>>, vector<8x32xf32>,
    %c2_i32 = arith.constant 2 : i32
    %c8_i32_32 = arith.constant 8 : i32
    %89 = arith.muli %c2_i32, %c8_i32_32 : i32
    %90 = tpu.assume_multiple %89, 8 : i32
    %c0_33 = arith.constant 0 : index
    %91 = arith.index_cast %90 : i32 to index
    %c0_34 = arith.constant 0 : index
    %92 = vector.load %arg11[%c0_33, %91, %c0_34] : memref<1x64x128xf32, #tpu.memory_space<vmem>>, vector<1x8x128xf32>
    %93 = vector.shape_cast %92 : vector<1x8x128xf32> to vector<8x128xf32>
    %94 = arith.truncf %83 : vector<8x32xf32> to vector<8x32xbf16>
    %cst_35 = arith.constant dense<0.000000e+00> : vector<8x128xf32>
    %95 = tpu.matmul %94, %1, %cst_35 {dimension_numbers = #tpu.dot_dimension_numbers<[1], [0], [0], [1], [0, 0, 1, 1], [], []>} : vector<8x32xbf16>, vector<32x128xbf16>, vector<8x128xf32> -> vector<8x128xf32>
    %96 = arith.addf %93, %95 : vector<8x128xf32>
    %97 = vector.extract_strided_slice %96 {offsets = [0, 0], sizes = [8, 32], strides = [1, 1]} : vector<8x128xf32> to vector<8x32xf32>
    %98 = arith.negf %97 : vector<8x32xf32>
    %99 = math.exp %98 : vector<8x32xf32>
    %cst_36 = arith.constant 1.000000e+00 : f32
    %100 = vector.broadcast %cst_36 : f32 to vector<8x32xf32>
    %101 = arith.addf %100, %99 : vector<8x32xf32>
    %102 = arith.divf %100, %101 : vector<8x32xf32>
    %103 = vector.extract_strided_slice %96 {offsets = [0, 32], sizes = [8, 32], strides = [1, 1]} : vector<8x128xf32> to vector<8x32xf32>
    %104 = arith.negf %103 : vector<8x32xf32>
    %105 = math.exp %104 : vector<8x32xf32>
    %cst_37 = arith.constant 1.000000e+00 : f32
    %106 = vector.broadcast %cst_37 : f32 to vector<8x32xf32>
    %107 = arith.addf %106, %105 : vector<8x32xf32>
    %108 = arith.divf %106, %107 : vector<8x32xf32>
    %109 = vector.extract_strided_slice %96 {offsets = [0, 64], sizes = [8, 32], strides = [1, 1]} : vector<8x128xf32> to vector<8x32xf32>
    %110 = math.tanh %109 : vector<8x32xf32>
    %111 = vector.extract_strided_slice %96 {offsets = [0, 96], sizes = [8, 32], strides = [1, 1]} : vector<8x128xf32> to vector<8x32xf32>
    %112 = arith.negf %111 : vector<8x32xf32>
    %113 = math.exp %112 : vector<8x32xf32>
    %cst_38 = arith.constant 1.000000e+00 : f32
    %114 = vector.broadcast %cst_38 : f32 to vector<8x32xf32>
    %115 = arith.addf %114, %113 : vector<8x32xf32>
    %116 = arith.divf %114, %115 : vector<8x32xf32>
    %117 = arith.mulf %108, %81 : vector<8x32xf32>
    %118 = arith.mulf %102, %110 : vector<8x32xf32>
    %119 = arith.addf %117, %118 : vector<8x32xf32>
    %120 = math.tanh %119 : vector<8x32xf32>
    %121 = arith.mulf %116, %120 : vector<8x32xf32>
    %c8_i32_39 = arith.constant 8 : i32
    %122 = arith.muli %c2_i32, %c8_i32_39 : i32
    %c0_i32_40 = arith.constant 0 : i32
    %123 = arith.addi %c0_i32_40, %122 : i32
    %124 = tpu.assume_multiple %123, 8 : i32
    %125 = arith.index_cast %124 : i32 to index
    %c0_41 = arith.constant 0 : index
    %126 = vector.load %arg12[%125, %c0_41] : memref<64x32xf32, #tpu.memory_space<vmem>>, vector<8x32xf32>
    tpu.vector_store %arg12[%125, %c0_41], %121 {strides = array<i32>} : memref<64x32xf32, #tpu.memory_space<vmem>>, vector<8x32xf32>,
    %c3_i32 = arith.constant 3 : i32
    %c8_i32_42 = arith.constant 8 : i32
    %127 = arith.muli %c3_i32, %c8_i32_42 : i32
    %128 = tpu.assume_multiple %127, 8 : i32
    %c0_43 = arith.constant 0 : index
    %129 = arith.index_cast %128 : i32 to index
    %c0_44 = arith.constant 0 : index
    %130 = vector.load %arg11[%c0_43, %129, %c0_44] : memref<1x64x128xf32, #tpu.memory_space<vmem>>, vector<1x8x128xf32>
    %131 = vector.shape_cast %130 : vector<1x8x128xf32> to vector<8x128xf32>
    %132 = arith.truncf %121 : vector<8x32xf32> to vector<8x32xbf16>
    %cst_45 = arith.constant dense<0.000000e+00> : vector<8x128xf32>
    %133 = tpu.matmul %132, %1, %cst_45 {dimension_numbers = #tpu.dot_dimension_numbers<[1], [0], [0], [1], [0, 0, 1, 1], [], []>} : vector<8x32xbf16>, vector<32x128xbf16>, vector<8x128xf32> -> vector<8x128xf32>
    %134 = arith.addf %131, %133 : vector<8x128xf32>
    %135 = vector.extract_strided_slice %134 {offsets = [0, 0], sizes = [8, 32], strides = [1, 1]} : vector<8x128xf32> to vector<8x32xf32>
    %136 = arith.negf %135 : vector<8x32xf32>
    %137 = math.exp %136 : vector<8x32xf32>
    %cst_46 = arith.constant 1.000000e+00 : f32
    %138 = vector.broadcast %cst_46 : f32 to vector<8x32xf32>
    %139 = arith.addf %138, %137 : vector<8x32xf32>
    %140 = arith.divf %138, %139 : vector<8x32xf32>
    %141 = vector.extract_strided_slice %134 {offsets = [0, 32], sizes = [8, 32], strides = [1, 1]} : vector<8x128xf32> to vector<8x32xf32>
    %142 = arith.negf %141 : vector<8x32xf32>
    %143 = math.exp %142 : vector<8x32xf32>
    %cst_47 = arith.constant 1.000000e+00 : f32
    %144 = vector.broadcast %cst_47 : f32 to vector<8x32xf32>
    %145 = arith.addf %144, %143 : vector<8x32xf32>
    %146 = arith.divf %144, %145 : vector<8x32xf32>
    %147 = vector.extract_strided_slice %134 {offsets = [0, 64], sizes = [8, 32], strides = [1, 1]} : vector<8x128xf32> to vector<8x32xf32>
    %148 = math.tanh %147 : vector<8x32xf32>
    %149 = vector.extract_strided_slice %134 {offsets = [0, 96], sizes = [8, 32], strides = [1, 1]} : vector<8x128xf32> to vector<8x32xf32>
    %150 = arith.negf %149 : vector<8x32xf32>
    %151 = math.exp %150 : vector<8x32xf32>
    %cst_48 = arith.constant 1.000000e+00 : f32
    %152 = vector.broadcast %cst_48 : f32 to vector<8x32xf32>
    %153 = arith.addf %152, %151 : vector<8x32xf32>
    %154 = arith.divf %152, %153 : vector<8x32xf32>
    %155 = arith.mulf %146, %119 : vector<8x32xf32>
    %156 = arith.mulf %140, %148 : vector<8x32xf32>
    %157 = arith.addf %155, %156 : vector<8x32xf32>
    %158 = math.tanh %157 : vector<8x32xf32>
    %159 = arith.mulf %154, %158 : vector<8x32xf32>
    %c8_i32_49 = arith.constant 8 : i32
    %160 = arith.muli %c3_i32, %c8_i32_49 : i32
    %c0_i32_50 = arith.constant 0 : i32
    %161 = arith.addi %c0_i32_50, %160 : i32
    %162 = tpu.assume_multiple %161, 8 : i32
    %163 = arith.index_cast %162 : i32 to index
    %c0_51 = arith.constant 0 : index
    %164 = vector.load %arg12[%163, %c0_51] : memref<64x32xf32, #tpu.memory_space<vmem>>, vector<8x32xf32>
    tpu.vector_store %arg12[%163, %c0_51], %159 {strides = array<i32>} : memref<64x32xf32, #tpu.memory_space<vmem>>, vector<8x32xf32>,
    %c4_i32 = arith.constant 4 : i32
    %c8_i32_52 = arith.constant 8 : i32
    %165 = arith.muli %c4_i32, %c8_i32_52 : i32
    %166 = tpu.assume_multiple %165, 8 : i32
    %c0_53 = arith.constant 0 : index
    %167 = arith.index_cast %166 : i32 to index
    %c0_54 = arith.constant 0 : index
    %168 = vector.load %arg11[%c0_53, %167, %c0_54] : memref<1x64x128xf32, #tpu.memory_space<vmem>>, vector<1x8x128xf32>
    %169 = vector.shape_cast %168 : vector<1x8x128xf32> to vector<8x128xf32>
    %170 = arith.truncf %159 : vector<8x32xf32> to vector<8x32xbf16>
    %cst_55 = arith.constant dense<0.000000e+00> : vector<8x128xf32>
    %171 = tpu.matmul %170, %1, %cst_55 {dimension_numbers = #tpu.dot_dimension_numbers<[1], [0], [0], [1], [0, 0, 1, 1], [], []>} : vector<8x32xbf16>, vector<32x128xbf16>, vector<8x128xf32> -> vector<8x128xf32>
    %172 = arith.addf %169, %171 : vector<8x128xf32>
    %173 = vector.extract_strided_slice %172 {offsets = [0, 0], sizes = [8, 32], strides = [1, 1]} : vector<8x128xf32> to vector<8x32xf32>
    %174 = arith.negf %173 : vector<8x32xf32>
    %175 = math.exp %174 : vector<8x32xf32>
    %cst_56 = arith.constant 1.000000e+00 : f32
    %176 = vector.broadcast %cst_56 : f32 to vector<8x32xf32>
    %177 = arith.addf %176, %175 : vector<8x32xf32>
    %178 = arith.divf %176, %177 : vector<8x32xf32>
    %179 = vector.extract_strided_slice %172 {offsets = [0, 32], sizes = [8, 32], strides = [1, 1]} : vector<8x128xf32> to vector<8x32xf32>
    %180 = arith.negf %179 : vector<8x32xf32>
    %181 = math.exp %180 : vector<8x32xf32>
    %cst_57 = arith.constant 1.000000e+00 : f32
    %182 = vector.broadcast %cst_57 : f32 to vector<8x32xf32>
    %183 = arith.addf %182, %181 : vector<8x32xf32>
    %184 = arith.divf %182, %183 : vector<8x32xf32>
    %185 = vector.extract_strided_slice %172 {offsets = [0, 64], sizes = [8, 32], strides = [1, 1]} : vector<8x128xf32> to vector<8x32xf32>
    %186 = math.tanh %185 : vector<8x32xf32>
    %187 = vector.extract_strided_slice %172 {offsets = [0, 96], sizes = [8, 32], strides = [1, 1]} : vector<8x128xf32> to vector<8x32xf32>
    %188 = arith.negf %187 : vector<8x32xf32>
    %189 = math.exp %188 : vector<8x32xf32>
    %cst_58 = arith.constant 1.000000e+00 : f32
    %190 = vector.broadcast %cst_58 : f32 to vector<8x32xf32>
    %191 = arith.addf %190, %189 : vector<8x32xf32>
    %192 = arith.divf %190, %191 : vector<8x32xf32>
    %193 = arith.mulf %184, %157 : vector<8x32xf32>
    %194 = arith.mulf %178, %186 : vector<8x32xf32>
    %195 = arith.addf %193, %194 : vector<8x32xf32>
    %196 = math.tanh %195 : vector<8x32xf32>
    %197 = arith.mulf %192, %196 : vector<8x32xf32>
    %c8_i32_59 = arith.constant 8 : i32
    %198 = arith.muli %c4_i32, %c8_i32_59 : i32
    %c0_i32_60 = arith.constant 0 : i32
    %199 = arith.addi %c0_i32_60, %198 : i32
    %200 = tpu.assume_multiple %199, 8 : i32
    %201 = arith.index_cast %200 : i32 to index
    %c0_61 = arith.constant 0 : index
    %202 = vector.load %arg12[%201, %c0_61] : memref<64x32xf32, #tpu.memory_space<vmem>>, vector<8x32xf32>
    tpu.vector_store %arg12[%201, %c0_61], %197 {strides = array<i32>} : memref<64x32xf32, #tpu.memory_space<vmem>>, vector<8x32xf32>,
    %c5_i32 = arith.constant 5 : i32
    %c8_i32_62 = arith.constant 8 : i32
    %203 = arith.muli %c5_i32, %c8_i32_62 : i32
    %204 = tpu.assume_multiple %203, 8 : i32
    %c0_63 = arith.constant 0 : index
    %205 = arith.index_cast %204 : i32 to index
    %c0_64 = arith.constant 0 : index
    %206 = vector.load %arg11[%c0_63, %205, %c0_64] : memref<1x64x128xf32, #tpu.memory_space<vmem>>, vector<1x8x128xf32>
    %207 = vector.shape_cast %206 : vector<1x8x128xf32> to vector<8x128xf32>
    %208 = arith.truncf %197 : vector<8x32xf32> to vector<8x32xbf16>
    %cst_65 = arith.constant dense<0.000000e+00> : vector<8x128xf32>
    %209 = tpu.matmul %208, %1, %cst_65 {dimension_numbers = #tpu.dot_dimension_numbers<[1], [0], [0], [1], [0, 0, 1, 1], [], []>} : vector<8x32xbf16>, vector<32x128xbf16>, vector<8x128xf32> -> vector<8x128xf32>
    %210 = arith.addf %207, %209 : vector<8x128xf32>
    %211 = vector.extract_strided_slice %210 {offsets = [0, 0], sizes = [8, 32], strides = [1, 1]} : vector<8x128xf32> to vector<8x32xf32>
    %212 = arith.negf %211 : vector<8x32xf32>
    %213 = math.exp %212 : vector<8x32xf32>
    %cst_66 = arith.constant 1.000000e+00 : f32
    %214 = vector.broadcast %cst_66 : f32 to vector<8x32xf32>
    %215 = arith.addf %214, %213 : vector<8x32xf32>
    %216 = arith.divf %214, %215 : vector<8x32xf32>
    %217 = vector.extract_strided_slice %210 {offsets = [0, 32], sizes = [8, 32], strides = [1, 1]} : vector<8x128xf32> to vector<8x32xf32>
    %218 = arith.negf %217 : vector<8x32xf32>
    %219 = math.exp %218 : vector<8x32xf32>
    %cst_67 = arith.constant 1.000000e+00 : f32
    %220 = vector.broadcast %cst_67 : f32 to vector<8x32xf32>
    %221 = arith.addf %220, %219 : vector<8x32xf32>
    %222 = arith.divf %220, %221 : vector<8x32xf32>
    %223 = vector.extract_strided_slice %210 {offsets = [0, 64], sizes = [8, 32], strides = [1, 1]} : vector<8x128xf32> to vector<8x32xf32>
    %224 = math.tanh %223 : vector<8x32xf32>
    %225 = vector.extract_strided_slice %210 {offsets = [0, 96], sizes = [8, 32], strides = [1, 1]} : vector<8x128xf32> to vector<8x32xf32>
    %226 = arith.negf %225 : vector<8x32xf32>
    %227 = math.exp %226 : vector<8x32xf32>
    %cst_68 = arith.constant 1.000000e+00 : f32
    %228 = vector.broadcast %cst_68 : f32 to vector<8x32xf32>
    %229 = arith.addf %228, %227 : vector<8x32xf32>
    %230 = arith.divf %228, %229 : vector<8x32xf32>
    %231 = arith.mulf %222, %195 : vector<8x32xf32>
    %232 = arith.mulf %216, %224 : vector<8x32xf32>
    %233 = arith.addf %231, %232 : vector<8x32xf32>
    %234 = math.tanh %233 : vector<8x32xf32>
    %235 = arith.mulf %230, %234 : vector<8x32xf32>
    %c8_i32_69 = arith.constant 8 : i32
    %236 = arith.muli %c5_i32, %c8_i32_69 : i32
    %c0_i32_70 = arith.constant 0 : i32
    %237 = arith.addi %c0_i32_70, %236 : i32
    %238 = tpu.assume_multiple %237, 8 : i32
    %239 = arith.index_cast %238 : i32 to index
    %c0_71 = arith.constant 0 : index
    %240 = vector.load %arg12[%239, %c0_71] : memref<64x32xf32, #tpu.memory_space<vmem>>, vector<8x32xf32>
    tpu.vector_store %arg12[%239, %c0_71], %235 {strides = array<i32>} : memref<64x32xf32, #tpu.memory_space<vmem>>, vector<8x32xf32>,
    %c6_i32 = arith.constant 6 : i32
    %c8_i32_72 = arith.constant 8 : i32
    %241 = arith.muli %c6_i32, %c8_i32_72 : i32
    %242 = tpu.assume_multiple %241, 8 : i32
    %c0_73 = arith.constant 0 : index
    %243 = arith.index_cast %242 : i32 to index
    %c0_74 = arith.constant 0 : index
    %244 = vector.load %arg11[%c0_73, %243, %c0_74] : memref<1x64x128xf32, #tpu.memory_space<vmem>>, vector<1x8x128xf32>
    %245 = vector.shape_cast %244 : vector<1x8x128xf32> to vector<8x128xf32>
    %246 = arith.truncf %235 : vector<8x32xf32> to vector<8x32xbf16>
    %cst_75 = arith.constant dense<0.000000e+00> : vector<8x128xf32>
    %247 = tpu.matmul %246, %1, %cst_75 {dimension_numbers = #tpu.dot_dimension_numbers<[1], [0], [0], [1], [0, 0, 1, 1], [], []>} : vector<8x32xbf16>, vector<32x128xbf16>, vector<8x128xf32> -> vector<8x128xf32>
    %248 = arith.addf %245, %247 : vector<8x128xf32>
    %249 = vector.extract_strided_slice %248 {offsets = [0, 0], sizes = [8, 32], strides = [1, 1]} : vector<8x128xf32> to vector<8x32xf32>
    %250 = arith.negf %249 : vector<8x32xf32>
    %251 = math.exp %250 : vector<8x32xf32>
    %cst_76 = arith.constant 1.000000e+00 : f32
    %252 = vector.broadcast %cst_76 : f32 to vector<8x32xf32>
    %253 = arith.addf %252, %251 : vector<8x32xf32>
    %254 = arith.divf %252, %253 : vector<8x32xf32>
    %255 = vector.extract_strided_slice %248 {offsets = [0, 32], sizes = [8, 32], strides = [1, 1]} : vector<8x128xf32> to vector<8x32xf32>
    %256 = arith.negf %255 : vector<8x32xf32>
    %257 = math.exp %256 : vector<8x32xf32>
    %cst_77 = arith.constant 1.000000e+00 : f32
    %258 = vector.broadcast %cst_77 : f32 to vector<8x32xf32>
    %259 = arith.addf %258, %257 : vector<8x32xf32>
    %260 = arith.divf %258, %259 : vector<8x32xf32>
    %261 = vector.extract_strided_slice %248 {offsets = [0, 64], sizes = [8, 32], strides = [1, 1]} : vector<8x128xf32> to vector<8x32xf32>
    %262 = math.tanh %261 : vector<8x32xf32>
    %263 = vector.extract_strided_slice %248 {offsets = [0, 96], sizes = [8, 32], strides = [1, 1]} : vector<8x128xf32> to vector<8x32xf32>
    %264 = arith.negf %263 : vector<8x32xf32>
    %265 = math.exp %264 : vector<8x32xf32>
    %cst_78 = arith.constant 1.000000e+00 : f32
    %266 = vector.broadcast %cst_78 : f32 to vector<8x32xf32>
    %267 = arith.addf %266, %265 : vector<8x32xf32>
    %268 = arith.divf %266, %267 : vector<8x32xf32>
    %269 = arith.mulf %260, %233 : vector<8x32xf32>
    %270 = arith.mulf %254, %262 : vector<8x32xf32>
    %271 = arith.addf %269, %270 : vector<8x32xf32>
    %272 = math.tanh %271 : vector<8x32xf32>
    %273 = arith.mulf %268, %272 : vector<8x32xf32>
    %c8_i32_79 = arith.constant 8 : i32
    %274 = arith.muli %c6_i32, %c8_i32_79 : i32
    %c0_i32_80 = arith.constant 0 : i32
    %275 = arith.addi %c0_i32_80, %274 : i32
    %276 = tpu.assume_multiple %275, 8 : i32
    %277 = arith.index_cast %276 : i32 to index
    %c0_81 = arith.constant 0 : index
    %278 = vector.load %arg12[%277, %c0_81] : memref<64x32xf32, #tpu.memory_space<vmem>>, vector<8x32xf32>
    tpu.vector_store %arg12[%277, %c0_81], %273 {strides = array<i32>} : memref<64x32xf32, #tpu.memory_space<vmem>>, vector<8x32xf32>,
    %c7_i32 = arith.constant 7 : i32
    %c8_i32_82 = arith.constant 8 : i32
    %279 = arith.muli %c7_i32, %c8_i32_82 : i32
    %280 = tpu.assume_multiple %279, 8 : i32
    %c0_83 = arith.constant 0 : index
    %281 = arith.index_cast %280 : i32 to index
    %c0_84 = arith.constant 0 : index
    %282 = vector.load %arg11[%c0_83, %281, %c0_84] : memref<1x64x128xf32, #tpu.memory_space<vmem>>, vector<1x8x128xf32>
    %283 = vector.shape_cast %282 : vector<1x8x128xf32> to vector<8x128xf32>
    %284 = arith.truncf %273 : vector<8x32xf32> to vector<8x32xbf16>
    %cst_85 = arith.constant dense<0.000000e+00> : vector<8x128xf32>
    %285 = tpu.matmul %284, %1, %cst_85 {dimension_numbers = #tpu.dot_dimension_numbers<[1], [0], [0], [1], [0, 0, 1, 1], [], []>} : vector<8x32xbf16>, vector<32x128xbf16>, vector<8x128xf32> -> vector<8x128xf32>
    %286 = arith.addf %283, %285 : vector<8x128xf32>
    %287 = vector.extract_strided_slice %286 {offsets = [0, 0], sizes = [8, 32], strides = [1, 1]} : vector<8x128xf32> to vector<8x32xf32>
    %288 = arith.negf %287 : vector<8x32xf32>
    %289 = math.exp %288 : vector<8x32xf32>
    %cst_86 = arith.constant 1.000000e+00 : f32
    %290 = vector.broadcast %cst_86 : f32 to vector<8x32xf32>
    %291 = arith.addf %290, %289 : vector<8x32xf32>
    %292 = arith.divf %290, %291 : vector<8x32xf32>
    %293 = vector.extract_strided_slice %286 {offsets = [0, 32], sizes = [8, 32], strides = [1, 1]} : vector<8x128xf32> to vector<8x32xf32>
    %294 = arith.negf %293 : vector<8x32xf32>
    %295 = math.exp %294 : vector<8x32xf32>
    %cst_87 = arith.constant 1.000000e+00 : f32
    %296 = vector.broadcast %cst_87 : f32 to vector<8x32xf32>
    %297 = arith.addf %296, %295 : vector<8x32xf32>
    %298 = arith.divf %296, %297 : vector<8x32xf32>
    %299 = vector.extract_strided_slice %286 {offsets = [0, 64], sizes = [8, 32], strides = [1, 1]} : vector<8x128xf32> to vector<8x32xf32>
    %300 = math.tanh %299 : vector<8x32xf32>
    %301 = vector.extract_strided_slice %286 {offsets = [0, 96], sizes = [8, 32], strides = [1, 1]} : vector<8x128xf32> to vector<8x32xf32>
    %302 = arith.negf %301 : vector<8x32xf32>
    %303 = math.exp %302 : vector<8x32xf32>
    %cst_88 = arith.constant 1.000000e+00 : f32
    %304 = vector.broadcast %cst_88 : f32 to vector<8x32xf32>
    %305 = arith.addf %304, %303 : vector<8x32xf32>
    %306 = arith.divf %304, %305 : vector<8x32xf32>
    %307 = arith.mulf %298, %271 : vector<8x32xf32>
    %308 = arith.mulf %292, %300 : vector<8x32xf32>
    %309 = arith.addf %307, %308 : vector<8x32xf32>
    %310 = math.tanh %309 : vector<8x32xf32>
    %311 = arith.mulf %306, %310 : vector<8x32xf32>
    %c8_i32_89 = arith.constant 8 : i32
    %312 = arith.muli %c7_i32, %c8_i32_89 : i32
    %c0_i32_90 = arith.constant 0 : i32
    %313 = arith.addi %c0_i32_90, %312 : i32
    %314 = tpu.assume_multiple %313, 8 : i32
    %315 = arith.index_cast %314 : i32 to index
    %c0_91 = arith.constant 0 : index
    %316 = vector.load %arg12[%315, %c0_91] : memref<64x32xf32, #tpu.memory_space<vmem>>, vector<8x32xf32>
    tpu.vector_store %arg12[%315, %c0_91], %311 {strides = array<i32>} : memref<64x32xf32, #tpu.memory_space<vmem>>, vector<8x32xf32>,
    %c8_i32_92 = arith.constant 8 : i32
    %c0_93 = arith.constant 0 : index
    %c0_94 = arith.constant 0 : index
    %317 = vector.load %arg5[%c0_93, %c0_94] : memref<32x128xbf16, #tpu.memory_space<vmem>>, vector<32x128xbf16>
    %c0_95 = arith.constant 0 : index
    %c0_96 = arith.constant 0 : index
    %318 = vector.load %arg6[%c0_95, %c0_96] : memref<32x128xbf16, #tpu.memory_space<vmem>>, vector<32x128xbf16>
    %c0_97 = arith.constant 0 : index
    %c0_98 = arith.constant 0 : index
    %319 = vector.load %arg7[%c0_97, %c0_98] : memref<1x128xf32, #tpu.memory_space<vmem>>, vector<1x128xf32>
    %c0_99 = arith.constant 0 : index
    %c0_100 = arith.constant 0 : index
    %320 = vector.load %arg12[%c0_99, %c0_100] : memref<64x32xf32, #tpu.memory_space<vmem>>, vector<64x32xf32>
    %321 = arith.truncf %320 : vector<64x32xf32> to vector<64x32xbf16>
    %cst_101 = arith.constant dense<0.000000e+00> : vector<64x128xf32>
    %322 = tpu.matmul %321, %317, %cst_101 {dimension_numbers = #tpu.dot_dimension_numbers<[1], [0], [0], [1], [0, 0, 1, 1], [], []>} : vector<64x32xbf16>, vector<32x128xbf16>, vector<64x128xf32> -> vector<64x128xf32>
    %323 = vector.broadcast %319 : vector<1x128xf32> to vector<64x128xf32>
    %324 = arith.addf %322, %323 : vector<64x128xf32>
    %c0_102 = arith.constant 0 : index
    %c0_103 = arith.constant 0 : index
    %c0_104 = arith.constant 0 : index
    %325 = vector.load %arg11[%c0_102, %c0_103, %c0_104] : memref<1x64x128xf32, #tpu.memory_space<vmem>>, vector<1x64x128xf32>
    %326 = vector.shape_cast %325 : vector<1x64x128xf32> to vector<64x128xf32>
    %327 = vector.shape_cast %324 : vector<64x128xf32> to vector<1x64x128xf32>
    tpu.vector_store %arg11[%c0_102, %c0_103, %c0_104], %327 {strides = array<i32>} : memref<1x64x128xf32, #tpu.memory_space<vmem>>, vector<1x64x128xf32>,
    %cst_105 = arith.constant 0.000000e+00 : f32
    %328 = vector.broadcast %cst_105 : f32 to vector<8x32xf32>
    %cst_106 = arith.constant 0.000000e+00 : f32
    %329 = vector.broadcast %cst_106 : f32 to vector<8x32xf32>
    %c0_i32_107 = arith.constant 0 : i32
    %c8_i32_108 = arith.constant 8 : i32
    %330 = arith.muli %c0_i32_107, %c8_i32_108 : i32
    %331 = tpu.assume_multiple %330, 8 : i32
    %c0_109 = arith.constant 0 : index
    %332 = arith.index_cast %331 : i32 to index
    %c0_110 = arith.constant 0 : index
    %333 = vector.load %arg11[%c0_109, %332, %c0_110] : memref<1x64x128xf32, #tpu.memory_space<vmem>>, vector<1x8x128xf32>
    %334 = vector.shape_cast %333 : vector<1x8x128xf32> to vector<8x128xf32>
    %335 = arith.truncf %328 : vector<8x32xf32> to vector<8x32xbf16>
    %cst_111 = arith.constant dense<0.000000e+00> : vector<8x128xf32>
    %336 = tpu.matmul %335, %318, %cst_111 {dimension_numbers = #tpu.dot_dimension_numbers<[1], [0], [0], [1], [0, 0, 1, 1], [], []>} : vector<8x32xbf16>, vector<32x128xbf16>, vector<8x128xf32> -> vector<8x128xf32>
    %337 = arith.addf %334, %336 : vector<8x128xf32>
    %338 = vector.extract_strided_slice %337 {offsets = [0, 0], sizes = [8, 32], strides = [1, 1]} : vector<8x128xf32> to vector<8x32xf32>
    %339 = arith.negf %338 : vector<8x32xf32>
    %340 = math.exp %339 : vector<8x32xf32>
    %cst_112 = arith.constant 1.000000e+00 : f32
    %341 = vector.broadcast %cst_112 : f32 to vector<8x32xf32>
    %342 = arith.addf %341, %340 : vector<8x32xf32>
    %343 = arith.divf %341, %342 : vector<8x32xf32>
    %344 = vector.extract_strided_slice %337 {offsets = [0, 32], sizes = [8, 32], strides = [1, 1]} : vector<8x128xf32> to vector<8x32xf32>
    %345 = arith.negf %344 : vector<8x32xf32>
    %346 = math.exp %345 : vector<8x32xf32>
    %cst_113 = arith.constant 1.000000e+00 : f32
    %347 = vector.broadcast %cst_113 : f32 to vector<8x32xf32>
    %348 = arith.addf %347, %346 : vector<8x32xf32>
    %349 = arith.divf %347, %348 : vector<8x32xf32>
    %350 = vector.extract_strided_slice %337 {offsets = [0, 64], sizes = [8, 32], strides = [1, 1]} : vector<8x128xf32> to vector<8x32xf32>
    %351 = math.tanh %350 : vector<8x32xf32>
    %352 = vector.extract_strided_slice %337 {offsets = [0, 96], sizes = [8, 32], strides = [1, 1]} : vector<8x128xf32> to vector<8x32xf32>
    %353 = arith.negf %352 : vector<8x32xf32>
    %354 = math.exp %353 : vector<8x32xf32>
    %cst_114 = arith.constant 1.000000e+00 : f32
    %355 = vector.broadcast %cst_114 : f32 to vector<8x32xf32>
    %356 = arith.addf %355, %354 : vector<8x32xf32>
    %357 = arith.divf %355, %356 : vector<8x32xf32>
    %358 = arith.mulf %349, %329 : vector<8x32xf32>
    %359 = arith.mulf %343, %351 : vector<8x32xf32>
    %360 = arith.addf %358, %359 : vector<8x32xf32>
    %361 = math.tanh %360 : vector<8x32xf32>
    %362 = arith.mulf %357, %361 : vector<8x32xf32>
    %c1_i32_115 = arith.constant 1 : i32
    %c8_i32_116 = arith.constant 8 : i32
    %363 = arith.muli %c1_i32_115, %c8_i32_116 : i32
    %364 = tpu.assume_multiple %363, 8 : i32
    %c0_117 = arith.constant 0 : index
    %365 = arith.index_cast %364 : i32 to index
    %c0_118 = arith.constant 0 : index
    %366 = vector.load %arg11[%c0_117, %365, %c0_118] : memref<1x64x128xf32, #tpu.memory_space<vmem>>, vector<1x8x128xf32>
    %367 = vector.shape_cast %366 : vector<1x8x128xf32> to vector<8x128xf32>
    %368 = arith.truncf %362 : vector<8x32xf32> to vector<8x32xbf16>
    %cst_119 = arith.constant dense<0.000000e+00> : vector<8x128xf32>
    %369 = tpu.matmul %368, %318, %cst_119 {dimension_numbers = #tpu.dot_dimension_numbers<[1], [0], [0], [1], [0, 0, 1, 1], [], []>} : vector<8x32xbf16>, vector<32x128xbf16>, vector<8x128xf32> -> vector<8x128xf32>
    %370 = arith.addf %367, %369 : vector<8x128xf32>
    %371 = vector.extract_strided_slice %370 {offsets = [0, 0], sizes = [8, 32], strides = [1, 1]} : vector<8x128xf32> to vector<8x32xf32>
    %372 = arith.negf %371 : vector<8x32xf32>
    %373 = math.exp %372 : vector<8x32xf32>
    %cst_120 = arith.constant 1.000000e+00 : f32
    %374 = vector.broadcast %cst_120 : f32 to vector<8x32xf32>
    %375 = arith.addf %374, %373 : vector<8x32xf32>
    %376 = arith.divf %374, %375 : vector<8x32xf32>
    %377 = vector.extract_strided_slice %370 {offsets = [0, 32], sizes = [8, 32], strides = [1, 1]} : vector<8x128xf32> to vector<8x32xf32>
    %378 = arith.negf %377 : vector<8x32xf32>
    %379 = math.exp %378 : vector<8x32xf32>
    %cst_121 = arith.constant 1.000000e+00 : f32
    %380 = vector.broadcast %cst_121 : f32 to vector<8x32xf32>
    %381 = arith.addf %380, %379 : vector<8x32xf32>
    %382 = arith.divf %380, %381 : vector<8x32xf32>
    %383 = vector.extract_strided_slice %370 {offsets = [0, 64], sizes = [8, 32], strides = [1, 1]} : vector<8x128xf32> to vector<8x32xf32>
    %384 = math.tanh %383 : vector<8x32xf32>
    %385 = vector.extract_strided_slice %370 {offsets = [0, 96], sizes = [8, 32], strides = [1, 1]} : vector<8x128xf32> to vector<8x32xf32>
    %386 = arith.negf %385 : vector<8x32xf32>
    %387 = math.exp %386 : vector<8x32xf32>
    %cst_122 = arith.constant 1.000000e+00 : f32
    %388 = vector.broadcast %cst_122 : f32 to vector<8x32xf32>
    %389 = arith.addf %388, %387 : vector<8x32xf32>
    %390 = arith.divf %388, %389 : vector<8x32xf32>
    %391 = arith.mulf %382, %360 : vector<8x32xf32>
    %392 = arith.mulf %376, %384 : vector<8x32xf32>
    %393 = arith.addf %391, %392 : vector<8x32xf32>
    %394 = math.tanh %393 : vector<8x32xf32>
    %395 = arith.mulf %390, %394 : vector<8x32xf32>
    %c2_i32_123 = arith.constant 2 : i32
    %c8_i32_124 = arith.constant 8 : i32
    %396 = arith.muli %c2_i32_123, %c8_i32_124 : i32
    %397 = tpu.assume_multiple %396, 8 : i32
    %c0_125 = arith.constant 0 : index
    %398 = arith.index_cast %397 : i32 to index
    %c0_126 = arith.constant 0 : index
    %399 = vector.load %arg11[%c0_125, %398, %c0_126] : memref<1x64x128xf32, #tpu.memory_space<vmem>>, vector<1x8x128xf32>
    %400 = vector.shape_cast %399 : vector<1x8x128xf32> to vector<8x128xf32>
    %401 = arith.truncf %395 : vector<8x32xf32> to vector<8x32xbf16>
    %cst_127 = arith.constant dense<0.000000e+00> : vector<8x128xf32>
    %402 = tpu.matmul %401, %318, %cst_127 {dimension_numbers = #tpu.dot_dimension_numbers<[1], [0], [0], [1], [0, 0, 1, 1], [], []>} : vector<8x32xbf16>, vector<32x128xbf16>, vector<8x128xf32> -> vector<8x128xf32>
    %403 = arith.addf %400, %402 : vector<8x128xf32>
    %404 = vector.extract_strided_slice %403 {offsets = [0, 0], sizes = [8, 32], strides = [1, 1]} : vector<8x128xf32> to vector<8x32xf32>
    %405 = arith.negf %404 : vector<8x32xf32>
    %406 = math.exp %405 : vector<8x32xf32>
    %cst_128 = arith.constant 1.000000e+00 : f32
    %407 = vector.broadcast %cst_128 : f32 to vector<8x32xf32>
    %408 = arith.addf %407, %406 : vector<8x32xf32>
    %409 = arith.divf %407, %408 : vector<8x32xf32>
    %410 = vector.extract_strided_slice %403 {offsets = [0, 32], sizes = [8, 32], strides = [1, 1]} : vector<8x128xf32> to vector<8x32xf32>
    %411 = arith.negf %410 : vector<8x32xf32>
    %412 = math.exp %411 : vector<8x32xf32>
    %cst_129 = arith.constant 1.000000e+00 : f32
    %413 = vector.broadcast %cst_129 : f32 to vector<8x32xf32>
    %414 = arith.addf %413, %412 : vector<8x32xf32>
    %415 = arith.divf %413, %414 : vector<8x32xf32>
    %416 = vector.extract_strided_slice %403 {offsets = [0, 64], sizes = [8, 32], strides = [1, 1]} : vector<8x128xf32> to vector<8x32xf32>
    %417 = math.tanh %416 : vector<8x32xf32>
    %418 = vector.extract_strided_slice %403 {offsets = [0, 96], sizes = [8, 32], strides = [1, 1]} : vector<8x128xf32> to vector<8x32xf32>
    %419 = arith.negf %418 : vector<8x32xf32>
    %420 = math.exp %419 : vector<8x32xf32>
    %cst_130 = arith.constant 1.000000e+00 : f32
    %421 = vector.broadcast %cst_130 : f32 to vector<8x32xf32>
    %422 = arith.addf %421, %420 : vector<8x32xf32>
    %423 = arith.divf %421, %422 : vector<8x32xf32>
    %424 = arith.mulf %415, %393 : vector<8x32xf32>
    %425 = arith.mulf %409, %417 : vector<8x32xf32>
    %426 = arith.addf %424, %425 : vector<8x32xf32>
    %427 = math.tanh %426 : vector<8x32xf32>
    %428 = arith.mulf %423, %427 : vector<8x32xf32>
    %c3_i32_131 = arith.constant 3 : i32
    %c8_i32_132 = arith.constant 8 : i32
    %429 = arith.muli %c3_i32_131, %c8_i32_132 : i32
    %430 = tpu.assume_multiple %429, 8 : i32
    %c0_133 = arith.constant 0 : index
    %431 = arith.index_cast %430 : i32 to index
    %c0_134 = arith.constant 0 : index
    %432 = vector.load %arg11[%c0_133, %431, %c0_134] : memref<1x64x128xf32, #tpu.memory_space<vmem>>, vector<1x8x128xf32>
    %433 = vector.shape_cast %432 : vector<1x8x128xf32> to vector<8x128xf32>
    %434 = arith.truncf %428 : vector<8x32xf32> to vector<8x32xbf16>
    %cst_135 = arith.constant dense<0.000000e+00> : vector<8x128xf32>
    %435 = tpu.matmul %434, %318, %cst_135 {dimension_numbers = #tpu.dot_dimension_numbers<[1], [0], [0], [1], [0, 0, 1, 1], [], []>} : vector<8x32xbf16>, vector<32x128xbf16>, vector<8x128xf32> -> vector<8x128xf32>
    %436 = arith.addf %433, %435 : vector<8x128xf32>
    %437 = vector.extract_strided_slice %436 {offsets = [0, 0], sizes = [8, 32], strides = [1, 1]} : vector<8x128xf32> to vector<8x32xf32>
    %438 = arith.negf %437 : vector<8x32xf32>
    %439 = math.exp %438 : vector<8x32xf32>
    %cst_136 = arith.constant 1.000000e+00 : f32
    %440 = vector.broadcast %cst_136 : f32 to vector<8x32xf32>
    %441 = arith.addf %440, %439 : vector<8x32xf32>
    %442 = arith.divf %440, %441 : vector<8x32xf32>
    %443 = vector.extract_strided_slice %436 {offsets = [0, 32], sizes = [8, 32], strides = [1, 1]} : vector<8x128xf32> to vector<8x32xf32>
    %444 = arith.negf %443 : vector<8x32xf32>
    %445 = math.exp %444 : vector<8x32xf32>
    %cst_137 = arith.constant 1.000000e+00 : f32
    %446 = vector.broadcast %cst_137 : f32 to vector<8x32xf32>
    %447 = arith.addf %446, %445 : vector<8x32xf32>
    %448 = arith.divf %446, %447 : vector<8x32xf32>
    %449 = vector.extract_strided_slice %436 {offsets = [0, 64], sizes = [8, 32], strides = [1, 1]} : vector<8x128xf32> to vector<8x32xf32>
    %450 = math.tanh %449 : vector<8x32xf32>
    %451 = vector.extract_strided_slice %436 {offsets = [0, 96], sizes = [8, 32], strides = [1, 1]} : vector<8x128xf32> to vector<8x32xf32>
    %452 = arith.negf %451 : vector<8x32xf32>
    %453 = math.exp %452 : vector<8x32xf32>
    %cst_138 = arith.constant 1.000000e+00 : f32
    %454 = vector.broadcast %cst_138 : f32 to vector<8x32xf32>
    %455 = arith.addf %454, %453 : vector<8x32xf32>
    %456 = arith.divf %454, %455 : vector<8x32xf32>
    %457 = arith.mulf %448, %426 : vector<8x32xf32>
    %458 = arith.mulf %442, %450 : vector<8x32xf32>
    %459 = arith.addf %457, %458 : vector<8x32xf32>
    %460 = math.tanh %459 : vector<8x32xf32>
    %461 = arith.mulf %456, %460 : vector<8x32xf32>
    %c4_i32_139 = arith.constant 4 : i32
    %c8_i32_140 = arith.constant 8 : i32
    %462 = arith.muli %c4_i32_139, %c8_i32_140 : i32
    %463 = tpu.assume_multiple %462, 8 : i32
    %c0_141 = arith.constant 0 : index
    %464 = arith.index_cast %463 : i32 to index
    %c0_142 = arith.constant 0 : index
    %465 = vector.load %arg11[%c0_141, %464, %c0_142] : memref<1x64x128xf32, #tpu.memory_space<vmem>>, vector<1x8x128xf32>
    %466 = vector.shape_cast %465 : vector<1x8x128xf32> to vector<8x128xf32>
    %467 = arith.truncf %461 : vector<8x32xf32> to vector<8x32xbf16>
    %cst_143 = arith.constant dense<0.000000e+00> : vector<8x128xf32>
    %468 = tpu.matmul %467, %318, %cst_143 {dimension_numbers = #tpu.dot_dimension_numbers<[1], [0], [0], [1], [0, 0, 1, 1], [], []>} : vector<8x32xbf16>, vector<32x128xbf16>, vector<8x128xf32> -> vector<8x128xf32>
    %469 = arith.addf %466, %468 : vector<8x128xf32>
    %470 = vector.extract_strided_slice %469 {offsets = [0, 0], sizes = [8, 32], strides = [1, 1]} : vector<8x128xf32> to vector<8x32xf32>
    %471 = arith.negf %470 : vector<8x32xf32>
    %472 = math.exp %471 : vector<8x32xf32>
    %cst_144 = arith.constant 1.000000e+00 : f32
    %473 = vector.broadcast %cst_144 : f32 to vector<8x32xf32>
    %474 = arith.addf %473, %472 : vector<8x32xf32>
    %475 = arith.divf %473, %474 : vector<8x32xf32>
    %476 = vector.extract_strided_slice %469 {offsets = [0, 32], sizes = [8, 32], strides = [1, 1]} : vector<8x128xf32> to vector<8x32xf32>
    %477 = arith.negf %476 : vector<8x32xf32>
    %478 = math.exp %477 : vector<8x32xf32>
    %cst_145 = arith.constant 1.000000e+00 : f32
    %479 = vector.broadcast %cst_145 : f32 to vector<8x32xf32>
    %480 = arith.addf %479, %478 : vector<8x32xf32>
    %481 = arith.divf %479, %480 : vector<8x32xf32>
    %482 = vector.extract_strided_slice %469 {offsets = [0, 64], sizes = [8, 32], strides = [1, 1]} : vector<8x128xf32> to vector<8x32xf32>
    %483 = math.tanh %482 : vector<8x32xf32>
    %484 = vector.extract_strided_slice %469 {offsets = [0, 96], sizes = [8, 32], strides = [1, 1]} : vector<8x128xf32> to vector<8x32xf32>
    %485 = arith.negf %484 : vector<8x32xf32>
    %486 = math.exp %485 : vector<8x32xf32>
    %cst_146 = arith.constant 1.000000e+00 : f32
    %487 = vector.broadcast %cst_146 : f32 to vector<8x32xf32>
    %488 = arith.addf %487, %486 : vector<8x32xf32>
    %489 = arith.divf %487, %488 : vector<8x32xf32>
    %490 = arith.mulf %481, %459 : vector<8x32xf32>
    %491 = arith.mulf %475, %483 : vector<8x32xf32>
    %492 = arith.addf %490, %491 : vector<8x32xf32>
    %493 = math.tanh %492 : vector<8x32xf32>
    %494 = arith.mulf %489, %493 : vector<8x32xf32>
    %c5_i32_147 = arith.constant 5 : i32
    %c8_i32_148 = arith.constant 8 : i32
    %495 = arith.muli %c5_i32_147, %c8_i32_148 : i32
    %496 = tpu.assume_multiple %495, 8 : i32
    %c0_149 = arith.constant 0 : index
    %497 = arith.index_cast %496 : i32 to index
    %c0_150 = arith.constant 0 : index
    %498 = vector.load %arg11[%c0_149, %497, %c0_150] : memref<1x64x128xf32, #tpu.memory_space<vmem>>, vector<1x8x128xf32>
    %499 = vector.shape_cast %498 : vector<1x8x128xf32> to vector<8x128xf32>
    %500 = arith.truncf %494 : vector<8x32xf32> to vector<8x32xbf16>
    %cst_151 = arith.constant dense<0.000000e+00> : vector<8x128xf32>
    %501 = tpu.matmul %500, %318, %cst_151 {dimension_numbers = #tpu.dot_dimension_numbers<[1], [0], [0], [1], [0, 0, 1, 1], [], []>} : vector<8x32xbf16>, vector<32x128xbf16>, vector<8x128xf32> -> vector<8x128xf32>
    %502 = arith.addf %499, %501 : vector<8x128xf32>
    %503 = vector.extract_strided_slice %502 {offsets = [0, 0], sizes = [8, 32], strides = [1, 1]} : vector<8x128xf32> to vector<8x32xf32>
    %504 = arith.negf %503 : vector<8x32xf32>
    %505 = math.exp %504 : vector<8x32xf32>
    %cst_152 = arith.constant 1.000000e+00 : f32
    %506 = vector.broadcast %cst_152 : f32 to vector<8x32xf32>
    %507 = arith.addf %506, %505 : vector<8x32xf32>
    %508 = arith.divf %506, %507 : vector<8x32xf32>
    %509 = vector.extract_strided_slice %502 {offsets = [0, 32], sizes = [8, 32], strides = [1, 1]} : vector<8x128xf32> to vector<8x32xf32>
    %510 = arith.negf %509 : vector<8x32xf32>
    %511 = math.exp %510 : vector<8x32xf32>
    %cst_153 = arith.constant 1.000000e+00 : f32
    %512 = vector.broadcast %cst_153 : f32 to vector<8x32xf32>
    %513 = arith.addf %512, %511 : vector<8x32xf32>
    %514 = arith.divf %512, %513 : vector<8x32xf32>
    %515 = vector.extract_strided_slice %502 {offsets = [0, 64], sizes = [8, 32], strides = [1, 1]} : vector<8x128xf32> to vector<8x32xf32>
    %516 = math.tanh %515 : vector<8x32xf32>
    %517 = vector.extract_strided_slice %502 {offsets = [0, 96], sizes = [8, 32], strides = [1, 1]} : vector<8x128xf32> to vector<8x32xf32>
    %518 = arith.negf %517 : vector<8x32xf32>
    %519 = math.exp %518 : vector<8x32xf32>
    %cst_154 = arith.constant 1.000000e+00 : f32
    %520 = vector.broadcast %cst_154 : f32 to vector<8x32xf32>
    %521 = arith.addf %520, %519 : vector<8x32xf32>
    %522 = arith.divf %520, %521 : vector<8x32xf32>
    %523 = arith.mulf %514, %492 : vector<8x32xf32>
    %524 = arith.mulf %508, %516 : vector<8x32xf32>
    %525 = arith.addf %523, %524 : vector<8x32xf32>
    %526 = math.tanh %525 : vector<8x32xf32>
    %527 = arith.mulf %522, %526 : vector<8x32xf32>
    %c6_i32_155 = arith.constant 6 : i32
    %c8_i32_156 = arith.constant 8 : i32
    %528 = arith.muli %c6_i32_155, %c8_i32_156 : i32
    %529 = tpu.assume_multiple %528, 8 : i32
    %c0_157 = arith.constant 0 : index
    %530 = arith.index_cast %529 : i32 to index
    %c0_158 = arith.constant 0 : index
    %531 = vector.load %arg11[%c0_157, %530, %c0_158] : memref<1x64x128xf32, #tpu.memory_space<vmem>>, vector<1x8x128xf32>
    %532 = vector.shape_cast %531 : vector<1x8x128xf32> to vector<8x128xf32>
    %533 = arith.truncf %527 : vector<8x32xf32> to vector<8x32xbf16>
    %cst_159 = arith.constant dense<0.000000e+00> : vector<8x128xf32>
    %534 = tpu.matmul %533, %318, %cst_159 {dimension_numbers = #tpu.dot_dimension_numbers<[1], [0], [0], [1], [0, 0, 1, 1], [], []>} : vector<8x32xbf16>, vector<32x128xbf16>, vector<8x128xf32> -> vector<8x128xf32>
    %535 = arith.addf %532, %534 : vector<8x128xf32>
    %536 = vector.extract_strided_slice %535 {offsets = [0, 0], sizes = [8, 32], strides = [1, 1]} : vector<8x128xf32> to vector<8x32xf32>
    %537 = arith.negf %536 : vector<8x32xf32>
    %538 = math.exp %537 : vector<8x32xf32>
    %cst_160 = arith.constant 1.000000e+00 : f32
    %539 = vector.broadcast %cst_160 : f32 to vector<8x32xf32>
    %540 = arith.addf %539, %538 : vector<8x32xf32>
    %541 = arith.divf %539, %540 : vector<8x32xf32>
    %542 = vector.extract_strided_slice %535 {offsets = [0, 32], sizes = [8, 32], strides = [1, 1]} : vector<8x128xf32> to vector<8x32xf32>
    %543 = arith.negf %542 : vector<8x32xf32>
    %544 = math.exp %543 : vector<8x32xf32>
    %cst_161 = arith.constant 1.000000e+00 : f32
    %545 = vector.broadcast %cst_161 : f32 to vector<8x32xf32>
    %546 = arith.addf %545, %544 : vector<8x32xf32>
    %547 = arith.divf %545, %546 : vector<8x32xf32>
    %548 = vector.extract_strided_slice %535 {offsets = [0, 64], sizes = [8, 32], strides = [1, 1]} : vector<8x128xf32> to vector<8x32xf32>
    %549 = math.tanh %548 : vector<8x32xf32>
    %550 = vector.extract_strided_slice %535 {offsets = [0, 96], sizes = [8, 32], strides = [1, 1]} : vector<8x128xf32> to vector<8x32xf32>
    %551 = arith.negf %550 : vector<8x32xf32>
    %552 = math.exp %551 : vector<8x32xf32>
    %cst_162 = arith.constant 1.000000e+00 : f32
    %553 = vector.broadcast %cst_162 : f32 to vector<8x32xf32>
    %554 = arith.addf %553, %552 : vector<8x32xf32>
    %555 = arith.divf %553, %554 : vector<8x32xf32>
    %556 = arith.mulf %547, %525 : vector<8x32xf32>
    %557 = arith.mulf %541, %549 : vector<8x32xf32>
    %558 = arith.addf %556, %557 : vector<8x32xf32>
    %559 = math.tanh %558 : vector<8x32xf32>
    %560 = arith.mulf %555, %559 : vector<8x32xf32>
    %c7_i32_163 = arith.constant 7 : i32
    %c8_i32_164 = arith.constant 8 : i32
    %561 = arith.muli %c7_i32_163, %c8_i32_164 : i32
    %562 = tpu.assume_multiple %561, 8 : i32
    %c0_165 = arith.constant 0 : index
    %563 = arith.index_cast %562 : i32 to index
    %c0_166 = arith.constant 0 : index
    %564 = vector.load %arg11[%c0_165, %563, %c0_166] : memref<1x64x128xf32, #tpu.memory_space<vmem>>, vector<1x8x128xf32>
    %565 = vector.shape_cast %564 : vector<1x8x128xf32> to vector<8x128xf32>
    %566 = arith.truncf %560 : vector<8x32xf32> to vector<8x32xbf16>
    %cst_167 = arith.constant dense<0.000000e+00> : vector<8x128xf32>
    %567 = tpu.matmul %566, %318, %cst_167 {dimension_numbers = #tpu.dot_dimension_numbers<[1], [0], [0], [1], [0, 0, 1, 1], [], []>} : vector<8x32xbf16>, vector<32x128xbf16>, vector<8x128xf32> -> vector<8x128xf32>
    %568 = arith.addf %565, %567 : vector<8x128xf32>
    %569 = vector.extract_strided_slice %568 {offsets = [0, 0], sizes = [8, 32], strides = [1, 1]} : vector<8x128xf32> to vector<8x32xf32>
    %570 = arith.negf %569 : vector<8x32xf32>
    %571 = math.exp %570 : vector<8x32xf32>
    %cst_168 = arith.constant 1.000000e+00 : f32
    %572 = vector.broadcast %cst_168 : f32 to vector<8x32xf32>
    %573 = arith.addf %572, %571 : vector<8x32xf32>
    %574 = arith.divf %572, %573 : vector<8x32xf32>
    %575 = vector.extract_strided_slice %568 {offsets = [0, 32], sizes = [8, 32], strides = [1, 1]} : vector<8x128xf32> to vector<8x32xf32>
    %576 = arith.negf %575 : vector<8x32xf32>
    %577 = math.exp %576 : vector<8x32xf32>
    %cst_169 = arith.constant 1.000000e+00 : f32
    %578 = vector.broadcast %cst_169 : f32 to vector<8x32xf32>
    %579 = arith.addf %578, %577 : vector<8x32xf32>
    %580 = arith.divf %578, %579 : vector<8x32xf32>
    %581 = vector.extract_strided_slice %568 {offsets = [0, 64], sizes = [8, 32], strides = [1, 1]} : vector<8x128xf32> to vector<8x32xf32>
    %582 = math.tanh %581 : vector<8x32xf32>
    %583 = vector.extract_strided_slice %568 {offsets = [0, 96], sizes = [8, 32], strides = [1, 1]} : vector<8x128xf32> to vector<8x32xf32>
    %584 = arith.negf %583 : vector<8x32xf32>
    %585 = math.exp %584 : vector<8x32xf32>
    %cst_170 = arith.constant 1.000000e+00 : f32
    %586 = vector.broadcast %cst_170 : f32 to vector<8x32xf32>
    %587 = arith.addf %586, %585 : vector<8x32xf32>
    %588 = arith.divf %586, %587 : vector<8x32xf32>
    %589 = arith.mulf %580, %558 : vector<8x32xf32>
    %590 = arith.mulf %574, %582 : vector<8x32xf32>
    %591 = arith.addf %589, %590 : vector<8x32xf32>
    %592 = math.tanh %591 : vector<8x32xf32>
    %593 = arith.mulf %588, %592 : vector<8x32xf32>
    %c8_i32_171 = arith.constant 8 : i32
    %c0_172 = arith.constant 0 : index
    %c0_173 = arith.constant 0 : index
    %594 = vector.load %arg8[%c0_172, %c0_173] : memref<32x4xf32, #tpu.memory_space<vmem>>, vector<32x4xf32>
    %cst_174 = arith.constant dense<0.000000e+00> : vector<8x4xf32>
    %595 = tpu.matmul %593, %594, %cst_174 {dimension_numbers = #tpu.dot_dimension_numbers<[1], [0], [0], [1], [0, 0, 1, 1], [], []>} : vector<8x32xf32>, vector<32x4xf32>, vector<8x4xf32> -> vector<8x4xf32>
    %c0_175 = arith.constant 0 : index
    %c0_176 = arith.constant 0 : index
    %596 = vector.load %arg9[%c0_175, %c0_176] : memref<1x4xf32, #tpu.memory_space<vmem>>, vector<1x4xf32>
    %597 = vector.broadcast %596 : vector<1x4xf32> to vector<8x4xf32>
    %598 = arith.addf %595, %597 : vector<8x4xf32>
    %c0_177 = arith.constant 0 : index
    %c0_178 = arith.constant 0 : index
    %599 = vector.load %arg10[%c0_177, %c0_178] : memref<8x4xf32, #tpu.memory_space<vmem>>, vector<8x4xf32>
    tpu.vector_store %arg10[%c0_177, %c0_178], %598 {strides = array<i32>} : memref<8x4xf32, #tpu.memory_space<vmem>>, vector<8x4xf32>,
    return
  }
  func.func @transform_0(%arg0: i32) -> (i32, i32, i32) {
    %c0_i32 = arith.constant 0 : i32
    %c0_i32_0 = arith.constant 0 : i32
    %c0_i32_1 = arith.constant 0 : i32
    return %arg0, %c0_i32, %c0_i32_0 : i32, i32, i32
  }
  func.func @transform_1(%arg0: i32) -> (i32, i32) {
    %c0_i32 = arith.constant 0 : i32
    %c0_i32_0 = arith.constant 0 : i32
    %c0_i32_1 = arith.constant 0 : i32
    return %c0_i32, %c0_i32_0 : i32, i32
  }
  func.func @transform_2(%arg0: i32) -> (i32, i32) {
    %c0_i32 = arith.constant 0 : i32
    %c0_i32_0 = arith.constant 0 : i32
    %c0_i32_1 = arith.constant 0 : i32
    return %c0_i32, %c0_i32_0 : i32, i32
  }
  func.func @transform_3(%arg0: i32) -> (i32, i32) {
    %c0_i32 = arith.constant 0 : i32
    %c0_i32_0 = arith.constant 0 : i32
    %c0_i32_1 = arith.constant 0 : i32
    return %c0_i32, %c0_i32_0 : i32, i32
  }
  func.func @transform_4(%arg0: i32) -> (i32, i32) {
    %c0_i32 = arith.constant 0 : i32
    %c0_i32_0 = arith.constant 0 : i32
    %c0_i32_1 = arith.constant 0 : i32
    return %c0_i32, %c0_i32_0 : i32, i32
  }
  func.func @transform_5(%arg0: i32) -> (i32, i32) {
    %c0_i32 = arith.constant 0 : i32
    %c0_i32_0 = arith.constant 0 : i32
    %c0_i32_1 = arith.constant 0 : i32
    return %c0_i32, %c0_i32_0 : i32, i32
  }
  func.func @transform_6(%arg0: i32) -> (i32, i32) {
    %c0_i32 = arith.constant 0 : i32
    %c0_i32_0 = arith.constant 0 : i32
    %c0_i32_1 = arith.constant 0 : i32
    return %c0_i32, %c0_i32_0 : i32, i32
  }
  func.func @transform_7(%arg0: i32) -> (i32, i32) {
    %c0_i32 = arith.constant 0 : i32
    %c0_i32_0 = arith.constant 0 : i32
    %c0_i32_1 = arith.constant 0 : i32
    return %c0_i32, %c0_i32_0 : i32, i32
  }
  func.func @transform_8(%arg0: i32) -> (i32, i32) {
    %c0_i32 = arith.constant 0 : i32
    %c0_i32_0 = arith.constant 0 : i32
    %c0_i32_1 = arith.constant 0 : i32
    return %c0_i32, %c0_i32_0 : i32, i32
  }
  func.func @transform_9(%arg0: i32) -> (i32, i32) {
    %c0_i32 = arith.constant 0 : i32
    %c0_i32_0 = arith.constant 0 : i32
    return %arg0, %c0_i32 : i32, i32
  }
}

</mosaic_0001>

<bundles_post_ra>
// kernel: tpu_custom_call.1
= control target key start
LH: loop header
LB: loop body
LE: loop exit
PB: predicated region body
PF: predicated region fallthrough
CT: control target
= control target key end

     0   :  { %v2047_v0 = vmov 0.0   ;;  %vm2048_vm0 = vmmov 0   ;;  %vm80_vm1 = vcmask 130048   ;;  %v2049_v6 = vmov 0   ;;  %s2050_s19 = smov 64   ;;  %s2468_s1 = inlined_call_operand.vmem [shape: bf16[16,128], index: 1, kind: input, shape index: {}]   ;;  %s2469_s2 = inlined_call_operand.vmem [shape: bf16[32,128], index: 2, kind: input, shape index: {}]   ;;  %s2470_s0 = inlined_call_operand.vmem [shape: bf16[1,64,16], index: 0, kind: input, shape index: {}]   ;;  %s2471_s3 = inlined_call_operand.vmem [shape: f32[1,128], index: 3, kind: input, shape index: {}]   ;;  %s2472_s4 = inlined_call_operand.vmem [shape: bf16[32,128], index: 4, kind: input, shape index: {}]   ;;  %s2473_s5 = inlined_call_operand.vmem [shape: bf16[32,128], index: 5, kind: input, shape index: {}]   ;;  %s2474_s6 = inlined_call_operand.vmem [shape: f32[1,128], index: 6, kind: input, shape index: {}]   ;;  %s2475_s7 = inlined_call_operand.vmem [shape: f32[32,4], index: 7, kind: input, shape index: {}]   ;;  %s2476_s8 = inlined_call_operand.vmem [shape: f32[1,4], index: 8, kind: input, shape index: {}]   ;;  %s2477_s9 = inlined_call_operand.vmem [shape: f32[8,4], index: 9, kind: output, shape index: {}]  }
   0x1   :  { %1745 = vmatprep.subr.bf16.mxu1 %v2047_v0  ;;  %v1908_v1 = vld [vmem:[%s2468_s1] sm:$0xff]   ;;  %1749 = vmatprep.mubr.msk.bf16.mxu1 %vm2048_vm0, %v2047_v0  ;;  %v1911_v4 = vld [vmem:[%s2470_s0 + $0x8] sm:$0xff]   ;;  %vm179_vm2 = vcmask 261120   ;;  %v1913_v49 = vld [vmem:[%s2470_s0 + $0x10] sm:$0xff]   ;;  %vm1612_vm3 = vcmask 31744  }
   0x2   :  { %v2112_v2 = vld [vmem:[%s2469_s2] sm:$0xff]   ;;  %1735 = vmatprep.subr.bf16.mxu0 %v1908_v1  ;;  %v2126_v5 = vld [vmem:[%s2469_s2 + $0x8] sm:$0xff]   ;;  %v1914_v50 = vld [vmem:[%s2470_s0 + $0x18] sm:$0xff]  }
   0x3   :  { %v1910_v3 = vld [vmem:[%s2470_s0] sm:$0xff]   ;;  %1746 = vmatpush3.bf16.msra.mxu1 %v2112_v2  ;;  %1736 = vmatpush3.bf16.msra.mxu0 %v1908_v1 }
   0x4   :  { %1737 = vmatprep.mubr.msk.bf16.mxu0 %vm80_vm1, %v1910_v3  ;;  %1747 = vmatprep.subr.bf16.mxu1 %v2047_v0  ;;  %v2146_v7 = vld [vmem:[%s2471_s3] ss:$0 sm:$0xff]  ;;  %s2051_s3 = smov 32  }
   0x5   :  { %1761 = vmatprep.subr.bf16.mxu0 %v2047_v0 }
   0x6   :  { %1738 = vmatmul.mubr.msk.bf16.vlgmr.msra.gmra.mrb[0].mxu0 %vm80_vm1, %v1911_v4 }
   0x7   :  { %1748 = vmatpush3.bf16.msra.mxu1 %v2126_v5  ;;  %1762 = vmatpush3.bf16.msra.mxu0 %v2112_v2 }
   0x8   :  { %1753 = vmatprep.subr.bf16.mxu1 %v2047_v0  ;;  %1763 = vmatprep.subr.bf16.mxu0 %v2047_v0 }
   0x9   :  { %1741 = vmatprep.mubr.msk.bf16.mxu0 %vm80_vm1, %v1913_v49 }
   0xa   :  { %1750 = vmatmul.mubr.bf16.vlgmr.msra.gmra.mrb[0].mxu1 %v2049_v6 }
   0xb   :  { %1754 = vmatpush3.bf16.msra.mxu1 %v2112_v2  ;;  %1757 = vmatprep.mubr.msk.bf16.mxu1 %vm2048_vm0, %v2047_v0 }
   0xc   :  { %1755 = vmatprep.subr.bf16.mxu1 %v2047_v0  ;;  %1764 = vmatpush3.bf16.msra.mxu0 %v2126_v5 }
   0xd   :  { %1777 = vmatprep.subr.bf16.mxu0 %v2047_v0 }
   0xe   :  { %1742 = vmatmul.mubr.msk.bf16.gmra.mrb[4].mxu0 %vm80_vm1, %v1914_v50 }
   0xf   :  { %1756 = vmatpush3.bf16.msra.mxu1 %v2126_v5  ;;  %1765 = vmatprep.mubr.msk.bf16.mxu0 %vm2048_vm0, %v2047_v0 }
  0x10   :  { %1769 = vmatprep.subr.bf16.mxu1 %v2047_v0 }
  0xd9   :  { %v2148_v8 = vpop.f32.mrb[0].mxu0 }
  0xda   :  { %v127_v9 = vpop.f32.mrb[1].mxu0  ;;  %v136_v60 = vadd.f32 %v2148_v8, %v2146_v7 }
  0xdb   :  { %v128_v10 = vadd.f32 %v2146_v7, %v127_v9  ;;  %v2151_v11 = vpop.f32.mrb[2].mxu0 }
  0xdc   :  { %v130_v12 = vpop.f32.mrb[3].mxu0 }
  0xdd   :  { %v217_v13 = vpop.f32.mrb[0].mxu1  ;;  %v131_v33 = vadd.f32 %v2146_v7, %v130_v12 }
  0xde   :  { %v223_v14 = vadd.f32 %v217_v13, %v128_v10  ;;  %v1751_v15 = vpop.f32.mrb[1].mxu1 }
  0xdf   :  { %v220_v16 = vpop.f32.mrb[2].mxu1 }
  0xe0   :  { %1919 = vtanh.f32 %v223_v14  ;;  %v1752_v17 = vpop.f32.mrb[3].mxu1  ;;  %v1630_v19 = vmul.f32 -1.442695, %v223_v14 }
  0xe1   :  { %v2187_v55 = vpop.f32.mrb[4].mxu0 }
  0xe2   :  { %1921 = vpow2.f32 %v1630_v19  ;;  %v2189_v56 = vpop.f32.mrb[5].mxu0 }
  0xe3   :  { %v2191_v57 = vpop.f32.mrb[6].mxu0 }
  0xe4   :  { %v2193_v58 = vpop.f32.mrb[7].mxu0 }
  0xea   :  { %v1920_v18 = vpop.eup %1919 }
  0xeb   :  { %233 = vrot.lane.b32.xlu0 %v1920_v18, %s2050_s19 }
  0xec   :  { %v1922_v20 = vpop.eup %1921 }
  0xed   :  { %v227_v21 = vadd.f32 1.0, %v1922_v20 }
  0xef   :  { %1923 = vrcp.f32 %v227_v21 }
  0xf9   :  { %v1924_v22 = vpop.eup %1923 }
  0xfa   :  { %v231_v25 = vmul.f32 0.0, %v1924_v22 }
 0x15d   :  { %v234_v23 = vpop.permute.xlu0 %233 }
 0x15e   :  { %v236_v24 = vmul.f32 %v1924_v22, %v234_v23  ;;  %v139_v23 = vadd.f32 %v2151_v11, %v2146_v7 }
 0x160   :  { %238 = vrot.lane.b32.xlu0 %v236_v24, %s2051_s3 }
 0x1d2   :  { %v239_v26 = vpop.permute.xlu0 %238 }
 0x1d3   :  { %v241_v27 = vadd.f32 %v239_v26, %v231_v25 }
 0x1d5   :  { %1925 = vtanh.f32 %v241_v27 }
 0x1df   :  { %v1926_v28 = vpop.eup %1925 }
 0x1e0   :  { %244 = vrot.lane.b32.xlu1 %v1926_v28, %s2050_s19 }
 0x252   :  { %v245_v29 = vpop.permute.xlu1 %244 }
 0x253   :  { %v2156_v30 = vmul.f32 %v1924_v22, %v245_v29 }
 0x255   :  { %v255_v31 = vpack.c.bf16 %v2156_v30, %v2156_v30 }
 0x257   :  { %257 = vrot.lane.b32.xlu1 %v255_v31, %s2051_s3 }
 0x2c9   :  { %v258_v32 = vpop.permute.xlu1 %257 }
 0x2ca   :  { %1758 = vmatmul.mubr.msk.bf16.vlgmr.msra.gmra.mrb[4].mxu1 %vm179_vm2, %v258_v32 }
 0x2cb   :  { %1770 = vmatpush3.bf16.msra.mxu1 %v2112_v2  ;;  %1773 = vmatprep.mubr.msk.bf16.mxu1 %vm2048_vm0, %v2047_v0 }
 0x2cc   :  { %1771 = vmatprep.subr.bf16.mxu1 %v2047_v0 }
 0x2cf   :  { %1772 = vmatpush3.bf16.msra.mxu1 %v2126_v5 }
 0x2d0   :  { %1785 = vmatprep.subr.bf16.mxu1 %v2047_v0 }
 0x39d   :  { %v296_v34 = vpop.f32.mrb[4].mxu1 }
 0x39e   :  { %v302_v35 = vadd.f32 %v296_v34, %v131_v33  ;;  %v1759_v36 = vpop.f32.mrb[5].mxu1 }
 0x39f   :  { %v299_v37 = vpop.f32.mrb[6].mxu1 }
 0x3a0   :  { %1927 = vtanh.f32 %v302_v35  ;;  %v1760_v38 = vpop.f32.mrb[7].mxu1  ;;  %v1632_v40 = vmul.f32 -1.442695, %v302_v35 }
 0x3a2   :  { %1929 = vpow2.f32 %v1632_v40 }
 0x3aa   :  { %v1928_v39 = vpop.eup %1927 }
 0x3ab   :  { %312 = vrot.lane.b32.xlu0 %v1928_v39, %s2050_s19 }
 0x3ac   :  { %v1930_v41 = vpop.eup %1929 }
 0x3ad   :  { %v306_v42 = vadd.f32 1.0, %v1930_v41 }
 0x3af   :  { %1931 = vrcp.f32 %v306_v42 }
 0x3b9   :  { %v1932_v43 = vpop.eup %1931 }
 0x3ba   :  { %v310_v46 = vmul.f32 %v1932_v43, %v241_v27 }
 0x41d   :  { %v313_v44 = vpop.permute.xlu0 %312 }
 0x41e   :  { %v315_v45 = vmul.f32 %v1932_v43, %v313_v44  ;;  %v144_v44 = vadd.f32 %v2146_v7, %v2189_v56 }
 0x420   :  { %317 = vrot.lane.b32.xlu1 %v315_v45, %s2051_s3 }
 0x492   :  { %v318_v47 = vpop.permute.xlu1 %317 }
 0x493   :  { %v320_v48 = vadd.f32 %v318_v47, %v310_v46 }
 0x495   :  { %1933 = vtanh.f32 %v320_v48 }
 0x49f   :  { %v1934_v51 = vpop.eup %1933 }
 0x4a0   :  { %323 = vrot.lane.b32.xlu0 %v1934_v51, %s2050_s19 }
 0x512   :  { %v324_v52 = vpop.permute.xlu0 %323 }
 0x513   :  { %v2182_v53 = vmul.f32 %v1932_v43, %v324_v52 }
 0x515   :  { %v335_v54 = vpack.c.bf16 %v2182_v53, %v2182_v53 }
 0x517   :  { %337 = vrot.lane.b32.xlu1 %v335_v54, %s2051_s3 }
 0x589   :  { %v338_v59 = vpop.permute.xlu1 %337 }
 0x58a   :  { %1766 = vmatmul.mubr.msk.bf16.vlgmr.msra.gmra.mrb[8].mxu0 %vm179_vm2, %v338_v59 }
 0x58b   :  { %1778 = vmatpush3.bf16.msra.mxu0 %v2112_v2  ;;  %1781 = vmatprep.mubr.msk.bf16.mxu0 %vm2048_vm0, %v2047_v0 }
 0x58c   :  { %1779 = vmatprep.subr.bf16.mxu0 %v2047_v0 }
 0x58f   :  { %1780 = vmatpush3.bf16.msra.mxu0 %v2126_v5 }
 0x590   :  { %1793 = vmatprep.subr.bf16.mxu0 %v2047_v0 }
 0x65d   :  { %v376_v61 = vpop.f32.mrb[8].mxu0 }
 0x65e   :  { %v382_v62 = vadd.f32 %v376_v61, %v136_v60  ;;  %v1767_v63 = vpop.f32.mrb[9].mxu0 }
 0x65f   :  { %v379_v1 = vpop.f32.mrb[10].mxu0 }
 0x660   :  { %1935 = vtanh.f32 %v382_v62  ;;  %v1768_v3 = vpop.f32.mrb[11].mxu0  ;;  %v1634_v9 = vmul.f32 -1.442695, %v382_v62 }
 0x662   :  { %1937 = vpow2.f32 %v1634_v9 }
 0x66a   :  { %v1936_v4 = vpop.eup %1935 }
 0x66b   :  { %392 = vrot.lane.b32.xlu0 %v1936_v4, %s2050_s19 }
 0x66c   :  { %v1938_v10 = vpop.eup %1937 }
 0x66d   :  { %v386_v12 = vadd.f32 1.0, %v1938_v10 }
 0x66f   :  { %1939 = vrcp.f32 %v386_v12  ;;  %v147_v12 = vadd.f32 %v2146_v7, %v2193_v58 }
 0x679   :  { %v1940_v13 = vpop.eup %1939 }
 0x67a   :  { %v390_v8 = vmul.f32 %v1940_v13, %v320_v48 }
 0x6dd   :  { %v393_v14 = vpop.permute.xlu0 %392 }
 0x6de   :  { %v395_v15 = vmul.f32 %v1940_v13, %v393_v14 }
 0x6e0   :  { %397 = vrot.lane.b32.xlu1 %v395_v15, %s2051_s3 }
 0x752   :  { %v398_v16 = vpop.permute.xlu1 %397 }
 0x753   :  { %v400_v17 = vadd.f32 %v398_v16, %v390_v8 }
 0x755   :  { %1941 = vtanh.f32 %v400_v17 }
 0x75f   :  { %v1942_v18 = vpop.eup %1941 }
 0x760   :  { %403 = vrot.lane.b32.xlu0 %v1942_v18, %s2050_s19 }
 0x7d2   :  { %v404_v19 = vpop.permute.xlu0 %403 }
 0x7d3   :  { %v2207_v20 = vmul.f32 %v1940_v13, %v404_v19 }
 0x7d5   :  { %v415_v21 = vpack.c.bf16 %v2207_v20, %v2207_v20 }
 0x7d7   :  { %417 = vrot.lane.b32.xlu1 %v415_v21, %s2051_s3 }
 0x849   :  { %v418_v22 = vpop.permute.xlu1 %417 }
 0x84a   :  { %1774 = vmatmul.mubr.msk.bf16.vlgmr.msra.gmra.mrb[8].mxu1 %vm179_vm2, %v418_v22 }
 0x84b   :  { %1786 = vmatpush3.bf16.msra.mxu1 %v2112_v2  ;;  %1789 = vmatprep.mubr.msk.bf16.mxu1 %vm2048_vm0, %v2047_v0 }
 0x84c   :  { %1787 = vmatprep.subr.bf16.mxu1 %v2047_v0 }
 0x84f   :  { %1788 = vmatpush3.bf16.msra.mxu1 %v2126_v5 }
 0x850   :  { %1801 = vmatprep.subr.bf16.mxu1 %v2047_v0 }
 0x91d   :  { %v456_v24 = vpop.f32.mrb[8].mxu1 }
 0x91e   :  { %v462_v25 = vadd.f32 %v456_v24, %v139_v23  ;;  %v1775_v26 = vpop.f32.mrb[9].mxu1 }
 0x91f   :  { %v459_v27 = vpop.f32.mrb[10].mxu1 }
 0x920   :  { %1943 = vtanh.f32 %v462_v25  ;;  %v1776_v28 = vpop.f32.mrb[11].mxu1  ;;  %v1636_v31 = vmul.f32 -1.442695, %v462_v25 }
 0x922   :  { %1945 = vpow2.f32 %v1636_v31  ;;  %v152_v31 = vadd.f32 %v2187_v55, %v2146_v7 }
 0x92a   :  { %v1944_v29 = vpop.eup %1943 }
 0x92b   :  { %472 = vrot.lane.b32.xlu0 %v1944_v29, %s2050_s19 }
 0x92c   :  { %v1946_v32 = vpop.eup %1945 }
 0x92d   :  { %v466_v33 = vadd.f32 1.0, %v1946_v32 }
 0x92f   :  { %1947 = vrcp.f32 %v466_v33 }
 0x939   :  { %v1948_v34 = vpop.eup %1947 }
 0x93a   :  { %v470_v11 = vmul.f32 %v1948_v34, %v400_v17 }
 0x99d   :  { %v473_v35 = vpop.permute.xlu0 %472 }
 0x99e   :  { %v475_v36 = vmul.f32 %v1948_v34, %v473_v35 }
 0x9a0   :  { %477 = vrot.lane.b32.xlu1 %v475_v36, %s2051_s3 }
 0xa12   :  { %v478_v37 = vpop.permute.xlu1 %477 }
 0xa13   :  { %v480_v38 = vadd.f32 %v478_v37, %v470_v11 }
 0xa15   :  { %1949 = vtanh.f32 %v480_v38 }
 0xa1f   :  { %v1950_v39 = vpop.eup %1949 }
 0xa20   :  { %483 = vrot.lane.b32.xlu0 %v1950_v39, %s2050_s19 }
 0xa92   :  { %v484_v40 = vpop.permute.xlu0 %483 }
 0xa93   :  { %v2224_v41 = vmul.f32 %v1948_v34, %v484_v40 }
 0xa95   :  { %v495_v42 = vpack.c.bf16 %v2224_v41, %v2224_v41 }
 0xa97   :  { %497 = vrot.lane.b32.xlu1 %v495_v42, %s2051_s3 }
 0xb09   :  { %v498_v43 = vpop.permute.xlu1 %497 }
 0xb0a   :  { %1782 = vmatmul.mubr.msk.bf16.vlgmr.msra.gmra.mrb[12].mxu0 %vm179_vm2, %v498_v43 }
 0xb0b   :  { %1794 = vmatpush3.bf16.msra.mxu0 %v2112_v2  ;;  %1797 = vmatprep.mubr.msk.bf16.mxu0 %vm2048_vm0, %v2047_v0 }
 0xb0c   :  { %1795 = vmatprep.subr.bf16.mxu0 %v2047_v0 }
 0xb0f   :  { %1796 = vmatpush3.bf16.msra.mxu0 %v2126_v5 }
 0xbdd   :  { %v536_v45 = vpop.f32.mrb[12].mxu0 }
 0xbde   :  { %v542_v46 = vadd.f32 %v536_v45, %v144_v44  ;;  %v1783_v47 = vpop.f32.mrb[13].mxu0 }
 0xbdf   :  { %v539_v48 = vpop.f32.mrb[14].mxu0 }
 0xbe0   :  { %1951 = vtanh.f32 %v542_v46  ;;  %v1784_v49 = vpop.f32.mrb[15].mxu0  ;;  %v1638_v51 = vmul.f32 -1.442695, %v542_v46  ;;  %v1915_v48 = vld [vmem:[%s2472_s4] sm:$0xff]  }
 0xbe1   :  { %1809 = vmatprep.subr.bf16.mxu0 %v1915_v48 }
 0xbe2   :  { %1953 = vpow2.f32 %v1638_v51 }
 0xbea   :  { %v1952_v50 = vpop.eup %1951 }
 0xbeb   :  { %552 = vrot.lane.b32.xlu0 %v1952_v50, %s2050_s19 }
 0xbec   :  { %v1954_v52 = vpop.eup %1953 }
 0xbed   :  { %v546_v54 = vadd.f32 1.0, %v1954_v52 }
 0xbef   :  { %1955 = vrcp.f32 %v546_v54 }
 0xbf9   :  { %v1956_v59 = vpop.eup %1955 }
 0xbfa   :  { %v550_v56 = vmul.f32 %v1956_v59, %v480_v38 }
 0xc5d   :  { %v553_v60 = vpop.permute.xlu0 %552 }
 0xc5e   :  { %v555_v61 = vmul.f32 %v1956_v59, %v553_v60 }
 0xc60   :  { %557 = vrot.lane.b32.xlu1 %v555_v61, %s2051_s3 }
 0xcd2   :  { %v558_v62 = vpop.permute.xlu1 %557 }
 0xcd3   :  { %v560_v63 = vadd.f32 %v558_v62, %v550_v56  ;;  %v2299_v62 = vld [vmem:[%s2473_s5] sm:$0xff]  }
 0xcd5   :  { %1957 = vtanh.f32 %v560_v63 }
 0xcdf   :  { %v1958_v1 = vpop.eup %1957 }
 0xce0   :  { %563 = vrot.lane.b32.xlu0 %v1958_v1, %s2050_s19 }
 0xd52   :  { %v564_v3 = vpop.permute.xlu0 %563 }
 0xd53   :  { %v2240_v4 = vmul.f32 %v1956_v59, %v564_v3 }
 0xd55   :  { %v575_v9 = vpack.c.bf16 %v2240_v4, %v2240_v4 }
 0xd57   :  { %577 = vrot.lane.b32.xlu1 %v575_v9, %s2051_s3 }
 0xdc9   :  { %v578_v10 = vpop.permute.xlu1 %577 }
 0xdca   :  { %1790 = vmatmul.mubr.msk.bf16.vlgmr.msra.gmra.mrb[12].mxu1 %vm179_vm2, %v578_v10 }
 0xdcb   :  { %1802 = vmatpush3.bf16.msra.mxu1 %v2112_v2  ;;  %1805 = vmatprep.mubr.msk.bf16.mxu1 %vm2048_vm0, %v2047_v0 }
 0xdcc   :  { %1803 = vmatprep.subr.bf16.mxu1 %v2047_v0 }
 0xdcf   :  { %1804 = vmatpush3.bf16.msra.mxu1 %v2126_v5 }
 0xdd0   :  { %1821 = vmatprep.subr.bf16.mxu1 %v2047_v0 }
 0xe9d   :  { %v616_v13 = vpop.f32.mrb[12].mxu1 }
 0xe9e   :  { %v622_v14 = vadd.f32 %v616_v13, %v147_v12  ;;  %v1791_v15 = vpop.f32.mrb[13].mxu1 }
 0xe9f   :  { %v619_v8 = vpop.f32.mrb[14].mxu1 }
 0xea0   :  { %1959 = vtanh.f32 %v622_v14  ;;  %v1792_v16 = vpop.f32.mrb[15].mxu1  ;;  %v1640_v2 = vmul.f32 -1.442695, %v622_v14 }
 0xea2   :  { %1961 = vpow2.f32 %v1640_v2 }
 0xeaa   :  { %v1960_v17 = vpop.eup %1959 }
 0xeab   :  { %632 = vrot.lane.b32.xlu0 %v1960_v17, %s2050_s19  ;;  %v2336_v17 = vld [vmem:[%s2474_s6] ss:$0 sm:$0xff] }
 0xeac   :  { %v1962_v18 = vpop.eup %1961 }
 0xead   :  { %v626_v19 = vadd.f32 1.0, %v1962_v18 }
 0xeaf   :  { %1963 = vrcp.f32 %v626_v19 }
 0xeb9   :  { %v1964_v5 = vpop.eup %1963 }
 0xeba   :  { %v630_v58 = vmul.f32 %v1964_v5, %v560_v63  ;;  %v2307_v63 = vld [vmem:[%s2473_s5 + $0x8] sm:$0xff]  }
 0xf1d   :  { %v633_v21 = vpop.permute.xlu0 %632 }
 0xf1e   :  { %v635_v22 = vmul.f32 %v1964_v5, %v633_v21 }
 0xf20   :  { %637 = vrot.lane.b32.xlu1 %v635_v22, %s2051_s3 }
 0xf92   :  { %v638_v23 = vpop.permute.xlu1 %637 }
 0xf93   :  { %v640_v24 = vadd.f32 %v638_v23, %v630_v58 }
 0xf95   :  { %1965 = vtanh.f32 %v640_v24 }
 0xf9f   :  { %v1966_v25 = vpop.eup %1965 }
 0xfa0   :  { %643 = vrot.lane.b32.xlu0 %v1966_v25, %s2050_s19 }
0x1012   :  { %v644_v26 = vpop.permute.xlu0 %643 }
0x1013   :  { %v2257_v27 = vmul.f32 %v1964_v5, %v644_v26 }
0x1015   :  { %v655_v28 = vpack.c.bf16 %v2257_v27, %v2257_v27 }
0x1017   :  { %657 = vrot.lane.b32.xlu1 %v655_v28, %s2051_s3 }
0x1089   :  { %v658_v29 = vpop.permute.xlu1 %657 }
0x108a   :  { %1798 = vmatmul.mubr.msk.bf16.vlgmr.msra.gmra.mrb[16].mxu0 %vm179_vm2, %v658_v29 }
0x108b   :  { %1810 = vmatpush3.bf16.msra.mxu0 %v1915_v48 }
0x115d   :  { %v696_v32 = vpop.f32.mrb[16].mxu0 }
0x115e   :  { %v702_v33 = vadd.f32 %v696_v32, %v152_v31  ;;  %v1799_v34 = vpop.f32.mrb[17].mxu0 }
0x115f   :  { %v699_v35 = vpop.f32.mrb[18].mxu0 }
0x1160   :  { %1967 = vtanh.f32 %v702_v33  ;;  %v1800_v36 = vpop.f32.mrb[19].mxu0  ;;  %v1642_v37 = vmul.f32 -1.442695, %v702_v33 }
0x1162   :  { %1969 = vpow2.f32 %v1642_v37 }
0x116a   :  { %v1968_v11 = vpop.eup %1967 }
0x116b   :  { %712 = vrot.lane.b32.xlu0 %v1968_v11, %s2050_s19 }
0x116c   :  { %v1970_v38 = vpop.eup %1969 }
0x116d   :  { %v706_v39 = vadd.f32 1.0, %v1970_v38 }
0x116f   :  { %1971 = vrcp.f32 %v706_v39 }
0x1179   :  { %v1972_v40 = vpop.eup %1971 }
0x117a   :  { %v710_v55 = vmul.f32 %v1972_v40, %v640_v24 }
0x11dd   :  { %v713_v42 = vpop.permute.xlu0 %712 }
0x11de   :  { %v715_v43 = vmul.f32 %v1972_v40, %v713_v42 }
0x11e0   :  { %717 = vrot.lane.b32.xlu1 %v715_v43, %s2051_s3 }
0x11e4   :  { %249 = vrot.lane.b32.xlu1 %v2156_v30, %s2051_s3  ;;  %v1916_v30 = vld [vmem:[%s2472_s4 + $0x8] sm:$0xff]  }
0x11e5   :  { %1811 = vmatprep.subr.bf16.mxu0 %v1916_v30 }
0x11e6   :  { %1812 = vmatpush3.bf16.msra.mxu0 %v1916_v30 }
0x11e7   :  { %1837 = vmatprep.subr.bf16.mxu0 %v2047_v0 }
0x11e8   :  { %408 = vrot.lane.b32.xlu1 %v2207_v20, %s2051_s3 }
0x1252   :  { %v718_v44 = vpop.permute.xlu1 %717 }
0x1253   :  { %v2271_v45 = vadd.f32 %v718_v44, %v710_v55 }
0x1255   :  { %1973 = vtanh.f32 %v2271_v45 }
0x1256   :  { %v250_v46 = vpop.permute.xlu1 %249 }
0x1257   :  { %252 = vst.msk [vmem:[#allocation3] sm:$0xff] %vm179_vm2, %v250_v46 }
0x125a   :  { %v409_v47 = vpop.permute.xlu1 %408 }
0x125b   :  { %412 = vst.msk [vmem:[#allocation3 + $0x10] sm:$0xff] %vm179_vm2, %v409_v47 }
0x125e   :  { %v822_v59 = vld [vmem:[#allocation3] sm:$0xff] }
0x125f   :  { %v1974_v20 = vpop.eup %1973 }
0x1260   :  { %723 = vrot.lane.b32.xlu0 %v1974_v20, %s2050_s19 }
0x1264   :  { %328 = vrot.lane.b32.xlu0 %v2182_v53, %s2051_s3 }
0x1268   :  { %488 = vrot.lane.b32.xlu0 %v2224_v41, %s2051_s3  ;;  %v824_v41 = vld [vmem:[#allocation3 + $0x10] sm:$0xff] }
0x12d2   :  { %v724_v49 = vpop.permute.xlu0 %723 }
0x12d3   :  { %v2288_v50 = vmul.f32 %v1972_v40, %v724_v49 }
0x12d5   :  { %v735_v51 = vpack.c.bf16 %v2288_v50, %v2288_v50 }
0x12d6   :  { %v329_v52 = vpop.permute.xlu0 %328 }
0x12d7   :  { %332 = vst.msk [vmem:[#allocation3 + $0x8] sm:$0xff] %vm179_vm2, %v329_v52  ;;  %737 = vrot.lane.b32.xlu1 %v735_v51, %s2051_s3 }
0x12da   :  { %v489_v54 = vpop.permute.xlu0 %488 }
0x12db   :  { %492 = vst.msk [vmem:[#allocation3 + $0x18] sm:$0xff] %vm179_vm2, %v489_v54 }
0x12de   :  { %v823_v60 = vld [vmem:[#allocation3 + $0x8] sm:$0xff] }
0x12df   :  { %v830_v53 = vpack.c.bf16 %v823_v60, %v822_v59 }
0x12e1   :  { %1813 = vmatprep.mubr.msk.bf16.mxu0 %vm179_vm2, %v830_v53 }
0x12e2   :  { %v825_v61 = vld [vmem:[#allocation3 + $0x18] sm:$0xff] }
0x12e3   :  { %v831_v56 = vpack.c.bf16 %v825_v61, %v824_v41 }
0x12e5   :  { %1814 = vmatmul.mubr.msk.bf16.vlgmr.msra.gmra.mrb[20].mxu0 %vm179_vm2, %v831_v56 }
0x12e6   :  { %1838 = vmatpush3.bf16.msra.mxu0 %v2299_v62 }
0x12e7   :  { %1839 = vmatprep.subr.bf16.mxu0 %v2047_v0 }
0x12ea   :  { %1840 = vmatpush3.bf16.msra.mxu0 %v2307_v63 }
0x12eb   :  { %1853 = vmatprep.subr.bf16.mxu0 %v2047_v0 }
0x1349   :  { %v738_v1 = vpop.permute.xlu1 %737 }
0x134a   :  { %1806 = vmatmul.mubr.msk.bf16.vlgmr.msra.gmra.mrb[16].mxu1 %vm179_vm2, %v738_v1 }
0x134b   :  { %1822 = vmatpush3.bf16.msra.mxu1 %v2299_v62  ;;  %1825 = vmatprep.mubr.msk.bf16.mxu1 %vm2048_vm0, %v2047_v0 }
0x134c   :  { %1823 = vmatprep.subr.bf16.mxu1 %v2047_v0 }
0x134f   :  { %1824 = vmatpush3.bf16.msra.mxu1 %v2307_v63 }
0x1350   :  { %1829 = vmatprep.subr.bf16.mxu1 %v2047_v0 }
0x1352   :  { %1826 = vmatmul.mubr.bf16.vlgmr.msra.gmra.mrb[20].mxu1 %v2049_v6  ;;  %v155_v6 = vadd.f32 %v2191_v57, %v2146_v7 }
0x1353   :  { %1830 = vmatpush3.bf16.msra.mxu1 %v2299_v62  ;;  %1833 = vmatprep.mubr.msk.bf16.mxu1 %vm2048_vm0, %v2047_v0 }
0x1354   :  { %1831 = vmatprep.subr.bf16.mxu1 %v2047_v0 }
0x1357   :  { %1832 = vmatpush3.bf16.msra.mxu1 %v2307_v63 }
0x1358   :  { %1845 = vmatprep.subr.bf16.mxu1 %v2047_v0 }
0x13b8   :  { %v2325_v3 = vpop.f32.mrb[20].mxu0 }
0x13b9   :  { %v898_v9 = vpop.f32.mrb[21].mxu0 }
0x13ba   :  { %v2327_v10 = vpop.f32.mrb[22].mxu0  ;;  %v899_v2 = vadd.f32 %v2336_v17, %v898_v9 }
0x13bb   :  { %v2329_v12 = vpop.f32.mrb[23].mxu0 }
0x13bc   :  { %v902_v20 = vadd.f32 %v2336_v17, %v2329_v12 }
0x141d   :  { %v776_v13 = vpop.f32.mrb[16].mxu1 }
0x141e   :  { %v782_v14 = vadd.f32 %v776_v13, %v155_v6  ;;  %v1807_v15 = vpop.f32.mrb[17].mxu1 }
0x141f   :  { %v779_v8 = vpop.f32.mrb[18].mxu1 }
0x1420   :  { %v1808_v16 = vpop.f32.mrb[19].mxu1  ;;  %v1644_v34 = vmul.f32 -1.442695, %v782_v14 }
0x1425   :  { %v984_v18 = vpop.f32.mrb[20].mxu1 }
0x1426   :  { %v990_v19 = vadd.f32 %v984_v18, %v899_v2  ;;  %v1827_v5 = vpop.f32.mrb[21].mxu1 }
0x1427   :  { %v987_v21 = vpop.f32.mrb[22].mxu1 }
0x1428   :  { %1975 = vtanh.f32 %v990_v19  ;;  %v1828_v22 = vpop.f32.mrb[23].mxu1  ;;  %v1654_v7 = vmul.f32 -1.442695, %v990_v19 }
0x142a   :  { %1977 = vpow2.f32 %v1654_v7 }
0x1432   :  { %v1976_v58 = vpop.eup %1975 }
0x1433   :  { %1000 = vrot.lane.b32.xlu0 %v1976_v58, %s2050_s19 }
0x1434   :  { %v1978_v57 = vpop.eup %1977 }
0x1435   :  { %v994_v23 = vadd.f32 1.0, %v1978_v57 }
0x1437   :  { %1979 = vrcp.f32 %v994_v23 }
0x1441   :  { %v1980_v24 = vpop.eup %1979 }
0x1442   :  { %v998_v28 = vmul.f32 0.0, %v1980_v24 }
0x14a5   :  { %v1001_v25 = vpop.permute.xlu0 %1000 }
0x14a6   :  { %v1003_v26 = vmul.f32 %v1980_v24, %v1001_v25  ;;  %v907_v25 = vadd.f32 %v2325_v3, %v2336_v17 }
0x14a8   :  { %1005 = vrot.lane.b32.xlu1 %v1003_v26, %s2051_s3 }
0x151a   :  { %v1006_v29 = vpop.permute.xlu1 %1005 }
0x151b   :  { %v1008_v31 = vadd.f32 %v1006_v29, %v998_v28 }
0x151d   :  { %1981 = vtanh.f32 %v1008_v31 }
0x151e   :  { %1983 = vtanh.f32 %v782_v14 }
0x151f   :  { %1985 = vpow2.f32 %v1644_v34 }
0x1527   :  { %v1982_v32 = vpop.eup %1981 }
0x1528   :  { %1011 = vrot.lane.b32.xlu0 %v1982_v32, %s2050_s19  ;;  %v1984_v33 = vpop.eup %1983 }
0x1529   :  { %v1986_v35 = vpop.eup %1985 }
0x152a   :  { %v786_v36 = vadd.f32 1.0, %v1986_v35 }
0x152c   :  { %792 = vrot.lane.b32.xlu0 %v1984_v33, %s2050_s19  ;;  %1987 = vrcp.f32 %v786_v36 }
0x1536   :  { %v1988_v39 = vpop.eup %1987 }
0x1537   :  { %v790_v55 = vmul.f32 %v1988_v39, %v2271_v45 }
0x159a   :  { %v1012_v11 = vpop.permute.xlu0 %1011 }
0x159b   :  { %v1014_v37 = vmul.f32 %v1980_v24, %v1012_v11 }
0x159d   :  { %v1016_v38 = vpack.c.bf16 %v1014_v37, %v1014_v37 }
0x159e   :  { %v793_v40 = vpop.permute.xlu0 %792 }
0x159f   :  { %v795_v42 = vmul.f32 %v1988_v39, %v793_v40  ;;  %1018 = vrot.lane.b32.xlu1 %v1016_v38, %s2051_s3 }
0x15a1   :  { %797 = vrot.lane.b32.xlu0 %v795_v42, %s2051_s3 }
0x1611   :  { %v1019_v43 = vpop.permute.xlu1 %1018 }
0x1612   :  { %1834 = vmatmul.mubr.msk.bf16.vlgmr.msra.gmra.mrb[24].mxu1 %vm179_vm2, %v1019_v43 }
0x1613   :  { %v798_v44 = vpop.permute.xlu0 %797  ;;  %1846 = vmatpush3.bf16.msra.mxu1 %v2299_v62  ;;  %1849 = vmatprep.mubr.msk.bf16.mxu1 %vm2048_vm0, %v2047_v0 }
0x1614   :  { %v800_v46 = vadd.f32 %v798_v44, %v790_v55  ;;  %1847 = vmatprep.subr.bf16.mxu1 %v2047_v0 }
0x1616   :  { %1989 = vtanh.f32 %v800_v46 }
0x1617   :  { %1848 = vmatpush3.bf16.msra.mxu1 %v2307_v63 }
0x1618   :  { %1861 = vmatprep.subr.bf16.mxu1 %v2047_v0 }
0x1620   :  { %v1990_v47 = vpop.eup %1989 }
0x1621   :  { %803 = vrot.lane.b32.xlu0 %v1990_v47, %s2050_s19  ;;  %v910_v47 = vadd.f32 %v2327_v10, %v2336_v17 }
0x1625   :  { %568 = vrot.lane.b32.xlu0 %v2240_v4, %s2051_s3 }
0x1629   :  { %728 = vrot.lane.b32.xlu0 %v2288_v50, %s2051_s3 }
0x1693   :  { %v804_v45 = vpop.permute.xlu0 %803 }
0x1694   :  { %v806_v13 = vmul.f32 %v1988_v39, %v804_v45 }
0x1697   :  { %v569_v48 = vpop.permute.xlu0 %568 }
0x1698   :  { %572 = vst.msk [vmem:[#allocation3 + $0x20] sm:$0xff] %vm179_vm2, %v569_v48 }
0x169b   :  { %v729_v30 = vpop.permute.xlu0 %728 }
0x169c   :  { %732 = vst.msk [vmem:[#allocation3 + $0x30] sm:$0xff] %vm179_vm2, %v729_v30 }
0x169f   :  { %v826_v18 = vld [vmem:[#allocation3 + $0x20] sm:$0xff] }
0x16e5   :  { %v1057_v49 = vpop.f32.mrb[24].mxu1 }
0x16e6   :  { %v1063_v51 = vadd.f32 %v1057_v49, %v902_v20  ;;  %v1835_v52 = vpop.f32.mrb[25].mxu1 }
0x16e7   :  { %v1060_v54 = vpop.f32.mrb[26].mxu1 }
0x16e8   :  { %1991 = vtanh.f32 %v1063_v51  ;;  %v1836_v59 = vpop.f32.mrb[27].mxu1  ;;  %v1656_v50 = vmul.f32 -1.442695, %v1063_v51 }
0x16ea   :  { %1993 = vpow2.f32 %v1656_v50 }
0x16f2   :  { %v1992_v4 = vpop.eup %1991 }
0x16f3   :  { %1073 = vrot.lane.b32.xlu1 %v1992_v4, %s2050_s19 }
0x16f4   :  { %v1994_v60 = vpop.eup %1993 }
0x16f5   :  { %v1067_v53 = vadd.f32 1.0, %v1994_v60 }
0x16f7   :  { %1995 = vrcp.f32 %v1067_v53 }
0x1701   :  { %v1996_v41 = vpop.eup %1995 }
0x1702   :  { %v1071_v1 = vmul.f32 %v1996_v41, %v1008_v31 }
0x1765   :  { %v1074_v61 = vpop.permute.xlu1 %1073 }
0x1766   :  { %v1076_v56 = vmul.f32 %v1996_v41, %v1074_v61 }
0x1768   :  { %1078 = vrot.lane.b32.xlu1 %v1076_v56, %s2051_s3 }
0x17da   :  { %v1079_v9 = vpop.permute.xlu1 %1078 }
0x17db   :  { %v1081_v12 = vadd.f32 %v1079_v9, %v1071_v1 }
0x17dd   :  { %1997 = vtanh.f32 %v1081_v12 }
0x17e7   :  { %v1998_v6 = vpop.eup %1997 }
0x17e8   :  { %1084 = vrot.lane.b32.xlu1 %v1998_v6, %s2050_s19 }
0x17ec   :  { %648 = vrot.lane.b32.xlu1 %v2257_v27, %s2051_s3  ;;  %v828_v27 = vld [vmem:[#allocation3 + $0x30] sm:$0xff] }
0x17f0   :  { %808 = vrot.lane.b32.xlu1 %v806_v13, %s2051_s3 }
0x185a   :  { %v1085_v14 = vpop.permute.xlu1 %1084 }
0x185b   :  { %v1087_v15 = vmul.f32 %v1996_v41, %v1085_v14 }
0x185d   :  { %v1089_v8 = vpack.c.bf16 %v1087_v15, %v1087_v15 }
0x185e   :  { %v649_v16 = vpop.permute.xlu1 %648 }
0x185f   :  { %652 = vst.msk [vmem:[#allocation3 + $0x28] sm:$0xff] %vm179_vm2, %v649_v16  ;;  %1091 = vrot.lane.b32.xlu0 %v1089_v8, %s2051_s3 }
0x1862   :  { %v809_v2 = vpop.permute.xlu1 %808 }
0x1863   :  { %812 = vst.msk [vmem:[#allocation3 + $0x38] sm:$0xff] %vm179_vm2, %v809_v2 }
0x1866   :  { %v827_v19 = vld [vmem:[#allocation3 + $0x28] sm:$0xff] }
0x1867   :  { %v832_v5 = vpack.c.bf16 %v827_v19, %v826_v18 }
0x1869   :  { %1817 = vmatprep.mubr.msk.bf16.mxu0 %vm179_vm2, %v832_v5 }
0x186a   :  { %v829_v21 = vld [vmem:[#allocation3 + $0x38] sm:$0xff] }
0x186b   :  { %v833_v22 = vpack.c.bf16 %v829_v21, %v828_v27 }
0x186d   :  { %1818 = vmatmul.mubr.msk.bf16.gmra.mrb[24].mxu0 %vm179_vm2, %v833_v22 }
0x186e   :  { %1841 = vmatprep.mubr.msk.bf16.mxu0 %vm2048_vm0, %v2047_v0 }
0x18d1   :  { %v1092_v58 = vpop.permute.xlu0 %1091 }
0x18d2   :  { %1842 = vmatmul.mubr.msk.bf16.vlgmr.msra.gmra.mrb[28].mxu0 %vm179_vm2, %v1092_v58 }
0x18d3   :  { %1854 = vmatpush3.bf16.msra.mxu0 %v2299_v62  ;;  %1857 = vmatprep.mubr.msk.bf16.mxu0 %vm2048_vm0, %v2047_v0 }
0x18d4   :  { %1855 = vmatprep.subr.bf16.mxu0 %v2047_v0 }
0x18d7   :  { %1856 = vmatpush3.bf16.msra.mxu0 %v2307_v63 }
0x18d8   :  { %1869 = vmatprep.subr.bf16.mxu0 %v2047_v0 }
0x1940   :  { %v2382_v7 = vpop.f32.mrb[24].mxu0 }
0x1941   :  { %v2384_v57 = vpop.f32.mrb[25].mxu0 }
0x1942   :  { %v2386_v23 = vpop.f32.mrb[26].mxu0  ;;  %v915_v6 = vadd.f32 %v2336_v17, %v2384_v57 }
0x1943   :  { %v2388_v24 = vpop.f32.mrb[27].mxu0 }
0x19a5   :  { %v1130_v26 = vpop.f32.mrb[28].mxu0 }
0x19a6   :  { %v1136_v28 = vadd.f32 %v1130_v26, %v907_v25  ;;  %v1843_v29 = vpop.f32.mrb[29].mxu0 }
0x19a7   :  { %v1133_v31 = vpop.f32.mrb[30].mxu0 }
0x19a8   :  { %1999 = vtanh.f32 %v1136_v28  ;;  %v1844_v32 = vpop.f32.mrb[31].mxu0  ;;  %v1658_v34 = vmul.f32 -1.442695, %v1136_v28 }
0x19aa   :  { %2001 = vpow2.f32 %v1658_v34 }
0x19b2   :  { %v2000_v33 = vpop.eup %1999 }
0x19b3   :  { %1146 = vrot.lane.b32.xlu1 %v2000_v33, %s2050_s19  ;;  %v918_v33 = vadd.f32 %v2336_v17, %v2388_v24 }
0x19b4   :  { %v2002_v35 = vpop.eup %2001 }
0x19b5   :  { %v1140_v36 = vadd.f32 1.0, %v2002_v35 }
0x19b7   :  { %2003 = vrcp.f32 %v1140_v36 }
0x19c1   :  { %v2004_v11 = vpop.eup %2003 }
0x19c2   :  { %v1144_v3 = vmul.f32 %v2004_v11, %v1081_v12 }
0x1a25   :  { %v1147_v37 = vpop.permute.xlu1 %1146 }
0x1a26   :  { %v1149_v38 = vmul.f32 %v2004_v11, %v1147_v37 }
0x1a28   :  { %1151 = vrot.lane.b32.xlu0 %v1149_v38, %s2051_s3 }
0x1a9a   :  { %v1152_v39 = vpop.permute.xlu0 %1151 }
0x1a9b   :  { %v1154_v40 = vadd.f32 %v1152_v39, %v1144_v3 }
0x1a9d   :  { %2005 = vtanh.f32 %v1154_v40 }
0x1aa7   :  { %v2006_v42 = vpop.eup %2005 }
0x1aa8   :  { %1157 = vrot.lane.b32.xlu1 %v2006_v42, %s2050_s19 }
0x1b1a   :  { %v1158_v43 = vpop.permute.xlu1 %1157 }
0x1b1b   :  { %v1160_v55 = vmul.f32 %v2004_v11, %v1158_v43 }
0x1b1d   :  { %v1162_v44 = vpack.c.bf16 %v1160_v55, %v1160_v55 }
0x1b1f   :  { %1164 = vrot.lane.b32.xlu0 %v1162_v44, %s2051_s3 }
0x1b91   :  { %v1165_v46 = vpop.permute.xlu0 %1164 }
0x1b92   :  { %1850 = vmatmul.mubr.msk.bf16.vlgmr.msra.gmra.mrb[28].mxu1 %vm179_vm2, %v1165_v46 }
0x1b93   :  { %1862 = vmatpush3.bf16.msra.mxu1 %v2299_v62  ;;  %1865 = vmatprep.mubr.msk.bf16.mxu1 %vm2048_vm0, %v2047_v0 }
0x1b94   :  { %1863 = vmatprep.subr.bf16.mxu1 %v2047_v0 }
0x1b97   :  { %1864 = vmatpush3.bf16.msra.mxu1 %v2307_v63 }
0x1b98   :  { %1877 = vmatprep.subr.bf16.mxu1 %v2047_v0 }
0x1c65   :  { %v1203_v45 = vpop.f32.mrb[28].mxu1 }
0x1c66   :  { %v1209_v48 = vadd.f32 %v1203_v45, %v910_v47  ;;  %v1851_v30 = vpop.f32.mrb[29].mxu1 }
0x1c67   :  { %v1206_v20 = vpop.f32.mrb[30].mxu1  ;;  %v923_v30 = vadd.f32 %v2382_v7, %v2336_v17 }
0x1c68   :  { %2007 = vtanh.f32 %v1209_v48  ;;  %v1852_v49 = vpop.f32.mrb[31].mxu1  ;;  %v1660_v52 = vmul.f32 -1.442695, %v1209_v48 }
0x1c6a   :  { %2009 = vpow2.f32 %v1660_v52 }
0x1c72   :  { %v2008_v51 = vpop.eup %2007 }
0x1c73   :  { %1219 = vrot.lane.b32.xlu1 %v2008_v51, %s2050_s19 }
0x1c74   :  { %v2010_v54 = vpop.eup %2009 }
0x1c75   :  { %v1213_v59 = vadd.f32 1.0, %v2010_v54 }
0x1c77   :  { %2011 = vrcp.f32 %v1213_v59 }
0x1c81   :  { %v2012_v4 = vpop.eup %2011 }
0x1c82   :  { %v1217_v10 = vmul.f32 %v2012_v4, %v1154_v40 }
0x1ce5   :  { %v1220_v50 = vpop.permute.xlu1 %1219 }
0x1ce6   :  { %v1222_v60 = vmul.f32 %v2012_v4, %v1220_v50 }
0x1ce8   :  { %1224 = vrot.lane.b32.xlu0 %v1222_v60, %s2051_s3 }
0x1d5a   :  { %v1225_v53 = vpop.permute.xlu0 %1224 }
0x1d5b   :  { %v1227_v41 = vadd.f32 %v1225_v53, %v1217_v10 }
0x1d5d   :  { %2013 = vtanh.f32 %v1227_v41 }
0x1d67   :  { %v2014_v61 = vpop.eup %2013 }
0x1d68   :  { %1230 = vrot.lane.b32.xlu1 %v2014_v61, %s2050_s19 }
0x1dda   :  { %v1231_v56 = vpop.permute.xlu1 %1230 }
0x1ddb   :  { %v1233_v1 = vmul.f32 %v2012_v4, %v1231_v56 }
0x1ddd   :  { %v1235_v9 = vpack.c.bf16 %v1233_v1, %v1233_v1 }
0x1ddf   :  { %1237 = vrot.lane.b32.xlu0 %v1235_v9, %s2051_s3 }
0x1e51   :  { %v1238_v12 = vpop.permute.xlu0 %1237 }
0x1e52   :  { %1858 = vmatmul.mubr.msk.bf16.vlgmr.msra.gmra.mrb[32].mxu0 %vm179_vm2, %v1238_v12 }
0x1e53   :  { %1870 = vmatpush3.bf16.msra.mxu0 %v2299_v62  ;;  %1873 = vmatprep.mubr.msk.bf16.mxu0 %vm2048_vm0, %v2047_v0 }
0x1e54   :  { %1871 = vmatprep.subr.bf16.mxu0 %v2047_v0 }
0x1e57   :  { %1872 = vmatpush3.bf16.msra.mxu0 %v2307_v63 }
0x1f25   :  { %v1276_v13 = vpop.f32.mrb[32].mxu0 }
0x1f26   :  { %v1282_v14 = vadd.f32 %v1276_v13, %v915_v6  ;;  %v1859_v15 = vpop.f32.mrb[33].mxu0  ;;  %v926_v13 = vadd.f32 %v2386_v23, %v2336_v17 }
0x1f27   :  { %v1279_v8 = vpop.f32.mrb[34].mxu0 }
0x1f28   :  { %2015 = vtanh.f32 %v1282_v14  ;;  %v1860_v16 = vpop.f32.mrb[35].mxu0  ;;  %v1662_v18 = vmul.f32 -1.442695, %v1282_v14 }
0x1f2a   :  { %2017 = vpow2.f32 %v1662_v18 }
0x1f32   :  { %v2016_v2 = vpop.eup %2015 }
0x1f33   :  { %1292 = vrot.lane.b32.xlu1 %v2016_v2, %s2050_s19 }
0x1f34   :  { %v2018_v19 = vpop.eup %2017 }
0x1f35   :  { %v1286_v5 = vadd.f32 1.0, %v2018_v19 }
0x1f37   :  { %2019 = vrcp.f32 %v1286_v5 }
0x1f41   :  { %v2020_v27 = vpop.eup %2019 }
0x1f42   :  { %v1290_v58 = vmul.f32 %v2020_v27, %v1227_v41 }
0x1fa5   :  { %v1293_v21 = vpop.permute.xlu1 %1292 }
0x1fa6   :  { %v1295_v22 = vmul.f32 %v2020_v27, %v1293_v21 }
0x1fa8   :  { %1297 = vrot.lane.b32.xlu0 %v1295_v22, %s2051_s3 }
0x201a   :  { %v1298_v57 = vpop.permute.xlu0 %1297 }
0x201b   :  { %v1300_v25 = vadd.f32 %v1298_v57, %v1290_v58 }
0x201d   :  { %2021 = vtanh.f32 %v1300_v25 }
0x2027   :  { %v2022_v26 = vpop.eup %2021 }
0x2028   :  { %1303 = vrot.lane.b32.xlu1 %v2022_v26, %s2050_s19  ;;  %v1526_v26 = vld [vmem:[%s2475_s7] sm:$0xff] }
0x209a   :  { %v1304_v28 = vpop.permute.xlu1 %1303 }
0x209b   :  { %v1306_v29 = vmul.f32 %v2020_v27, %v1304_v28  ;;  %v1527_v28 = vld [vmem:[%s2475_s7 + $0x8] sm:$0xff] }
0x209d   :  { %v1308_v31 = vpack.c.bf16 %v1306_v29, %v1306_v29  ;;  %v1528_v29 = vld [vmem:[%s2475_s7 + $0x10] sm:$0xff] }
0x209f   :  { %1310 = vrot.lane.b32.xlu0 %v1308_v31, %s2051_s3  ;;  %v1897_v31 = vpack.c.bf16 %v1527_v28, %v1526_v26 }
0x2111   :  { %v1311_v32 = vpop.permute.xlu0 %1310 }
0x2112   :  { %1866 = vmatmul.mubr.msk.bf16.vlgmr.msra.gmra.mrb[32].mxu1 %vm179_vm2, %v1311_v32  ;;  %v1529_v32 = vld [vmem:[%s2475_s7 + $0x18] sm:$0xff] }
0x2113   :  { %1878 = vmatpush3.bf16.msra.mxu1 %v2299_v62  ;;  %1881 = vmatprep.mubr.msk.bf16.mxu1 %vm2048_vm0, %v2047_v0 }
0x2114   :  { %1879 = vmatprep.subr.bf16.mxu1 %v2047_v0 }
0x2117   :  { %1880 = vmatpush3.bf16.msra.mxu1 %v2307_v63 }
0x21e5   :  { %v1349_v34 = vpop.f32.mrb[32].mxu1 }
0x21e6   :  { %v1355_v35 = vadd.f32 %v1349_v34, %v918_v33  ;;  %v1867_v36 = vpop.f32.mrb[33].mxu1  ;;  %v1900_v33 = vpack.c.bf16 %v1529_v32, %v1528_v29 }
0x21e7   :  { %v1352_v11 = vpop.f32.mrb[34].mxu1 }
0x21e8   :  { %2023 = vtanh.f32 %v1355_v35  ;;  %v1868_v37 = vpop.f32.mrb[35].mxu1  ;;  %v1664_v62 = vmul.f32 -1.442695, %v1355_v35 }
0x21e9   :  { %v1669_v37 = vld [vmem:[%s2476_s8] ss:$0 sm:$0xff] }
0x21ea   :  { %2025 = vpow2.f32 %v1664_v62 }
0x21f2   :  { %v2024_v38 = vpop.eup %2023 }
0x21f3   :  { %1365 = vrot.lane.b32.xlu1 %v2024_v38, %s2050_s19 }
0x21f4   :  { %v2026_v3 = vpop.eup %2025 }
0x21f5   :  { %v1359_v39 = vadd.f32 1.0, %v2026_v3 }
0x21f7   :  { %2027 = vrcp.f32 %v1359_v39 }
0x2201   :  { %v2028_v40 = vpop.eup %2027 }
0x2202   :  { %v1363_v24 = vmul.f32 %v2028_v40, %v1300_v25  ;;  %v2052_v25 = vmov 0.0|0.0  }
0x2203   :  { %1896 = vmatprep.subr.bf16.mxu0 %v2052_v25 }
0x2265   :  { %v1366_v42 = vpop.permute.xlu1 %1365 }
0x2266   :  { %v1368_v63 = vmul.f32 %v2028_v40, %v1366_v42 }
0x2268   :  { %1370 = vrot.lane.b32.xlu0 %v1368_v63, %s2051_s3 }
0x22da   :  { %v1371_v43 = vpop.permute.xlu0 %1370 }
0x22db   :  { %v1373_v55 = vadd.f32 %v1371_v43, %v1363_v24 }
0x22dd   :  { %2029 = vtanh.f32 %v1373_v55 }
0x22e7   :  { %v2030_v44 = vpop.eup %2029 }
0x22e8   :  { %1376 = vrot.lane.b32.xlu1 %v2030_v44, %s2050_s19 }
0x235a   :  { %v1377_v46 = vpop.permute.xlu1 %1376 }
0x235b   :  { %v1379_v47 = vmul.f32 %v2028_v40, %v1377_v46 }
0x235d   :  { %v1381_v45 = vpack.c.bf16 %v1379_v47, %v1379_v47 }
0x235f   :  { %1383 = vrot.lane.b32.xlu0 %v1381_v45, %s2051_s3 }
0x23d1   :  { %v1384_v48 = vpop.permute.xlu0 %1383 }
0x23d2   :  { %1874 = vmatmul.mubr.msk.bf16.vlgmr.msra.gmra.mrb[36].mxu0 %vm179_vm2, %v1384_v48 }
0x23d3   :  { %1893 = vmatprep.mubr.msk.f32.mxu0 %vm2048_vm0, %v2047_v0  ;;  %1898 = vmatpush3.bf16.msra.mxu0 %v1897_v31 }
0x23d4   :  { %1899 = vmatprep.subr.bf16.mxu0 %v2052_v25 }
0x23d7   :  { %1901 = vmatpush3.bf16.msra.mxu0 %v1900_v33 }
0x24a5   :  { %v1422_v20 = vpop.f32.mrb[36].mxu0 }
0x24a6   :  { %v1428_v49 = vadd.f32 %v1422_v20, %v923_v30  ;;  %v1875_v51 = vpop.f32.mrb[37].mxu0 }
0x24a7   :  { %v1425_v52 = vpop.f32.mrb[38].mxu0 }
0x24a8   :  { %2031 = vtanh.f32 %v1428_v49  ;;  %v1876_v54 = vpop.f32.mrb[39].mxu0  ;;  %v1666_v4 = vmul.f32 -1.442695, %v1428_v49 }
0x24aa   :  { %2033 = vpow2.f32 %v1666_v4 }
0x24b2   :  { %v2032_v59 = vpop.eup %2031 }
0x24b3   :  { %1438 = vrot.lane.b32.xlu1 %v2032_v59, %s2050_s19 }
0x24b4   :  { %v2034_v50 = vpop.eup %2033 }
0x24b5   :  { %v1432_v60 = vadd.f32 1.0, %v2034_v50 }
0x24b7   :  { %2035 = vrcp.f32 %v1432_v60 }
0x24c1   :  { %v2036_v10 = vpop.eup %2035 }
0x24c2   :  { %v1436_v7 = vmul.f32 %v2036_v10, %v1373_v55 }
0x2525   :  { %v1439_v53 = vpop.permute.xlu1 %1438 }
0x2526   :  { %v1441_v0 = vmul.f32 %v2036_v10, %v1439_v53 }
0x2528   :  { %1443 = vrot.lane.b32.xlu0 %v1441_v0, %s2051_s3 }
0x259a   :  { %v1444_v41 = vpop.permute.xlu0 %1443 }
0x259b   :  { %v1446_v61 = vadd.f32 %v1444_v41, %v1436_v7 }
0x259d   :  { %2037 = vtanh.f32 %v1446_v61 }
0x25a7   :  { %v2038_v56 = vpop.eup %2037 }
0x25a8   :  { %1449 = vrot.lane.b32.xlu1 %v2038_v56, %s2050_s19 }
0x261a   :  { %v1450_v1 = vpop.permute.xlu1 %1449 }
0x261b   :  { %v1452_v9 = vmul.f32 %v2036_v10, %v1450_v1 }
0x261d   :  { %v1454_v12 = vpack.c.bf16 %v1452_v9, %v1452_v9 }
0x261f   :  { %1456 = vrot.lane.b32.xlu0 %v1454_v12, %s2051_s3 }
0x2691   :  { %v1457_v6 = vpop.permute.xlu0 %1456 }
0x2692   :  { %1882 = vmatmul.mubr.msk.bf16.vlgmr.msra.gmra.mrb[36].mxu1 %vm179_vm2, %v1457_v6 }
0x2765   :  { %v1495_v14 = vpop.f32.mrb[36].mxu1 }
0x2766   :  { %v1501_v15 = vadd.f32 %v1495_v14, %v926_v13  ;;  %v1883_v8 = vpop.f32.mrb[37].mxu1 }
0x2767   :  { %v1498_v16 = vpop.f32.mrb[38].mxu1 }
0x2768   :  { %2039 = vtanh.f32 %v1501_v15  ;;  %v1884_v2 = vpop.f32.mrb[39].mxu1  ;;  %v1668_v19 = vmul.f32 -1.442695, %v1501_v15 }
0x276a   :  { %2041 = vpow2.f32 %v1668_v19 }
0x2772   :  { %v2040_v18 = vpop.eup %2039 }
0x2773   :  { %1511 = vrot.lane.b32.xlu1 %v2040_v18, %s2050_s19 }
0x2774   :  { %v2042_v5 = vpop.eup %2041 }
0x2775   :  { %v1505_v27 = vadd.f32 1.0, %v2042_v5 }
0x2777   :  { %2043 = vrcp.f32 %v1505_v27 }
0x2781   :  { %v2044_v21 = vpop.eup %2043 }
0x2782   :  { %v1509_v17 = vmul.f32 %v2044_v21, %v1446_v61 }
0x27e5   :  { %v1512_v22 = vpop.permute.xlu1 %1511 }
0x27e6   :  { %v1514_v58 = vmul.f32 %v2044_v21, %v1512_v22 }
0x27e8   :  { %1516 = vrot.lane.b32.xlu0 %v1514_v58, %s2051_s3 }
0x285a   :  { %v1517_v23 = vpop.permute.xlu0 %1516 }
0x285b   :  { %v1519_v57 = vadd.f32 %v1517_v23, %v1509_v17 }
0x285d   :  { %2045 = vtanh.f32 %v1519_v57 }
0x2867   :  { %v2046_v34 = vpop.eup %2045 }
0x2868   :  { %1522 = vrot.lane.b32.xlu1 %v2046_v34, %s2050_s19 }
0x28da   :  { %v1523_v35 = vpop.permute.xlu1 %1522 }
0x28db   :  { %v1525_v36 = vmul.f32 %v2044_v21, %v1523_v35 }
0x28dd   :  { %1538 = vrot.lane.b32.xlu0 %v1525_v36, %s2051_s3 }
0x294f   :  { %v1539_v11 = vpop.permute.xlu0 %1538 }
0x2950   :  { %1894 = vmatmul.mubr.msk.f32.vlgmr.msra.gmra.mrb[40].mxu0 %vm179_vm2, %v1539_v11 }
0x2a23   :  { %v1608_v38 = vpop.f32.mrb[40].mxu0 }
0x2a24   :  { %v1609_v62 = vadd.f32 %v1669_v37, %v1608_v38  ;;  %v1895_v3 = vpop.f32.mrb[41].mxu0 }
0x2a26   :  { %1613 = vst.msk [vmem:[%s2477_s9] sm:$0xff] %vm1612_vm3, %v1609_v62 }

</bundles_post_ra>
